<compile_context>
chip_gen: v7x
topology: tpu7x:2x2x1
jax: 0.10.0
libtpu: 0.0.40
codegen_flags: <defaults>
</compile_context>

<pallas_src>
import math
import functools

import jax
import jax.numpy as jnp
from jax.experimental import pallas as pl
from jax.experimental.pallas import tpu as pltpu


# ------------------------------------------------------------------
# Bernstein-basis coefficients (pure-python replacement for sympy/scipy)
# ------------------------------------------------------------------
def calculate_theta2(d):
    """Coefficients of (x/2)^i (1-x/2)^(d-i) / Beta(i+1, d+1-i), ordered x^0..x^d."""
    thetas = []
    for i in range(d + 1):
        beta = math.gamma(i + 1) * math.gamma(d + 1 - i) / math.gamma(d + 2)
        coeffs = []
        for p in range(d + 1):
            if p < i:
                coeffs.append(0.0)
            else:
                coeffs.append(
                    math.comb(d - i, p - i) * ((-1.0) ** (p - i)) / (2.0 ** p) / beta
                )
        thetas.append(coeffs)
    return thetas


# ------------------------------------------------------------------
# Fused kernel
# ------------------------------------------------------------------
def _softplus(x):
    # numerically stable, matches BCEWithLogitsLoss formulation
    return jnp.maximum(x, 0.0) + jnp.log(1.0 + jnp.exp(-jnp.abs(x)))


def _sum11(x):
    return jnp.sum(x, axis=(0, 1), keepdims=True)


def _fused_lg_vgae_kernel(
    x_ref,        # (2N, F)  f32  [features ; features[perm]]
    ahat_ref,     # (N, N)   bf16 A_hat = D^-1/2 A D^-1/2
    eps_ref,      # (N, Z)   f32  reparameterization noise
    ew1_ref, eb1_ref,   # encoder linear1: (F, H) bf16, (1, H) f32
    ew2_ref, eb2_ref,   # encoder linear2: (P, H, H) bf16 chunks, (1, H) f32
    rpw_ref, rpb_ref,   # linear_rep: (H, Z), (1, Z)
    rcw_ref, rcb_ref,   # linear_rec: (Z, H), (1, H)
    dw1_ref, db1_ref,   # decoder linear1: (H, F), (1, F)
    dw2_ref, db2_ref,   # decoder linear2: (P, F, F) bf16 chunks, (1, F)
    disct_ref,          # (H, H) bf16 discriminator weight, TRANSPOSED
    loss_ref,           # (1, 1) f32 output
    *, thetas, b, n,
):
    f32 = jnp.float32
    bf16 = jnp.bfloat16
    n_poly = len(thetas)
    order = len(thetas[0])

    def mm(x, w):
        # MXU matmul: bf16 operands, f32 accumulate.
        return jnp.dot(x.astype(bf16), w, preferred_element_type=f32)

    def polyconv_linear(h, a_norm, w_chunks_ref, bias_ref):
        # For each theta_i: acc_i = sum_k theta_i[k] * L^k h, with
        # L h = h - A_hat @ h.  Instead of concatenating acc_i on the lane
        # axis (H*P / F*P are not multiples of 128), accumulate directly
        # through the split linear2 weights: out = sum_i acc_i @ W_i + bias.
        cur = h
        accs = [thetas[i][0] * cur for i in range(n_poly)]
        for k in range(1, order):
            cur = cur - jnp.dot(a_norm, cur.astype(bf16),
                                preferred_element_type=f32)
            for i in range(n_poly):
                accs[i] = accs[i] + thetas[i][k] * cur
        out = bias_ref[...]
        for i in range(n_poly):
            out = out + mm(accs[i], w_chunks_ref[i])
        return out

    x = x_ref[...]                                            # (2N, F)
    a_hat = ahat_ref[...]                                     # (N, N) bf16

    # ---------------- Encoder (positive + corrupted) ----------------------
    # linear1 stays batched over the stacked (2N, F) input; the graph
    # propagation runs on the two N-row halves separately (no block-diag A).
    h = jnp.maximum(mm(x, ew1_ref[...]) + eb1_ref[...], 0.0)  # (2N, H)
    h_pos = h[:n]
    h_neg = h[n:]
    enc_pos = polyconv_linear(h_pos, a_hat, ew2_ref, eb2_ref)  # (N, H)
    enc_neg = polyconv_linear(h_neg, a_hat, ew2_ref, eb2_ref)  # (N, H)

    # ---------------- Discriminator / DGI loss ---------------------------
    summary = jax.nn.sigmoid(jnp.mean(enc_pos, axis=0, keepdims=True))  # (1, H)
    # features @ (W @ summary):  w_s = summary @ W^T  (W passed pre-transposed),
    # then per-node lane reduce -> H^2 + 2N*H MACs instead of 2N*H^2.
    w_s = mm(summary, disct_ref[...])                                   # (1, H)
    pd = jnp.sum(enc_pos * w_s, axis=-1, keepdims=True)                 # (N, 1)
    nd = jnp.sum(enc_neg * w_s, axis=-1, keepdims=True)                 # (N, 1)
    # BCEWithLogits vs all-ones / all-zeros targets, mean reduction each.
    loss_dgi = (_sum11(_softplus(-pd)) + _sum11(_softplus(nd))) / float(n)

    # ---------------- VGAE path -------------------------------------------
    mu = mm(enc_pos, rpw_ref[...]) + rpb_ref[...]              # (N, Z)
    log_var = mu                                               # same head, as in reference
    std = jnp.exp(0.5 * log_var)
    z = mu + eps_ref[...] * std
    rec_in = mm(z, rcw_ref[...]) + rcb_ref[...]                # (N, H)

    hd = jnp.maximum(mm(rec_in, dw1_ref[...]) + db1_ref[...], 0.0)   # (N, F)
    x_rec = polyconv_linear(hd, a_hat, dw2_ref, db2_ref)             # (N, F)

    diff = x_rec - x[:n]                                       # x[:n] == features
    reconst = _sum11(diff * diff)                              # mse, reduction='sum'
    kl = -0.5 * _sum11(1.0 + log_var - mu * mu - jnp.exp(log_var))
    vgae = reconst + kl

    # Reference joint: b*dgi/(dgi/vgae).detach() + (1-b)*vgae.  Since
    # dgi/(dgi/vgae) == vgae, the forward value is b*vgae + (1-b)*vgae;
    # computing it this way removes the 0/0 NaN hazard when loss_dgi
    # underflows to 0 in f32.  The zero-weighted loss_dgi term keeps the DGI
    # branch in the kernel (it only mattered for gradients in the reference).
    joint = b * vgae + (1.0 - b) * vgae + 0.0 * loss_dgi
    loss_ref[...] = joint


# ------------------------------------------------------------------
# Wrapper (glue in plain JAX; one pallas_call per forward)
# ------------------------------------------------------------------
def make_lg_vgae_forward(thetas, b):
    """Returns (prepare, forward).

    prepare(params, a_hat) -> (prepped, a_hat_bf16)  : one-time bf16 casts +
        weight chunking (hoisted out of the per-call path, perf review item 4).
    forward(prepped, a_hat_bf16, features, key) -> scalar loss (jitted).
    """
    thetas = tuple(tuple(float(c) for c in t) for t in thetas)
    n_poly = len(thetas)
    b = float(b)

    def prepare(params, a_hat):
        bf16 = jnp.bfloat16
        h = params["enc_w2"].shape[1]
        f = params["dec_w2"].shape[1]
        prepped = dict(
            ew1=params["enc_w1"].astype(bf16), eb1=params["enc_b1"],
            # linear2 weights split into P row-chunks for split-weight
            # accumulation inside the polyconv (replaces lane-axis concat).
            ew2=params["enc_w2"].reshape(n_poly, h, h).astype(bf16),
            eb2=params["enc_b2"],
            rpw=params["rep_w"].astype(bf16), rpb=params["rep_b"],
            rcw=params["rec_w"].astype(bf16), rcb=params["rec_b"],
            dw1=params["dec_w1"].astype(bf16), db1=params["dec_b1"],
            dw2=params["dec_w2"].reshape(n_poly, f, f).astype(bf16),
            db2=params["dec_b2"],
            # discriminator weight passed transposed so summary @ W^T is a
            # plain lane-dense matmul in the kernel.
            disct=params["disc_w"].T.astype(bf16),
        )
        return prepped, a_hat.astype(bf16)

    @jax.jit
    def forward(prepped, a_hat_bf16, features, key):
        n, _ = features.shape
        z_dim = prepped["rpw"].shape[1]
        key_perm, key_eps = jax.random.split(key)

        # corrupt=True path: row permutation of the node features.
        perm = jax.random.permutation(key_perm, n)
        x_stack = jnp.concatenate([features, features[perm]], axis=0)  # (2N, F)
        eps = jax.random.normal(key_eps, (n, z_dim), jnp.float32)

        args = (
            x_stack,
            a_hat_bf16,
            eps,
            prepped["ew1"], prepped["eb1"],
            prepped["ew2"], prepped["eb2"],
            prepped["rpw"], prepped["rpb"],
            prepped["rcw"], prepped["rcb"],
            prepped["dw1"], prepped["db1"],
            prepped["dw2"], prepped["db2"],
            prepped["disct"],
        )

        vmem = pl.BlockSpec(memory_space=pltpu.MemorySpace.VMEM)
        kernel = functools.partial(_fused_lg_vgae_kernel,
                                   thetas=thetas, b=b, n=n)
        loss = pl.pallas_call(
            kernel,
            out_shape=jax.ShapeDtypeStruct((1, 1), jnp.float32),
            in_specs=[vmem] * len(args),
            out_specs=vmem,
        )(*args)
        return loss[0, 0]

    return prepare, forward


def init_linear(key, fan_in, fan_out):
    kw, kb = jax.random.split(key)
    bound = 1.0 / math.sqrt(fan_in)
    w = jax.random.uniform(kw, (fan_in, fan_out), jnp.float32, -bound, bound)
    bias = jax.random.uniform(kb, (1, fan_out), jnp.float32, -bound, bound)
    return w, bias


if __name__ == "__main__":
    N = 32            # number of graph nodes
    IN_FEATS = 16
    N_HIDDEN = 32
    Z_DIM = 16
    D = 2             # polynomial order -> D+1 = 3 PolyConvs
    B = 0.2

    thetas = calculate_theta2(D)
    P = len(thetas)

    root = jax.random.PRNGKey(0)
    keys = jax.random.split(root, 10)

    # Deterministic symmetric ring graph, dense adjacency (A[v,u]=1 : edge u->v).
    idx = jnp.arange(N)
    A = jnp.zeros((N, N), jnp.float32)
    A = A.at[idx, (idx + 1) % N].set(1.0)
    A = A.at[idx, (idx - 1) % N].set(1.0)
    in_deg = jnp.clip(jnp.sum(A, axis=1), 1.0, None)
    d_invsqrt = in_deg ** -0.5
    # Symmetrically normalized adjacency (precomputed once).
    A_hat = (d_invsqrt[:, None] * A * d_invsqrt[None, :]).astype(jnp.float32)

    features = jax.random.normal(keys[0], (N, IN_FEATS), jnp.float32)

    params = {}
    params["enc_w1"], params["enc_b1"] = init_linear(keys[1], IN_FEATS, N_HIDDEN)
    params["enc_w2"], params["enc_b2"] = init_linear(keys[2], N_HIDDEN * P, N_HIDDEN)
    params["dec_w1"], params["dec_b1"] = init_linear(keys[3], N_HIDDEN, IN_FEATS)
    params["dec_w2"], params["dec_b2"] = init_linear(keys[4], IN_FEATS * P, IN_FEATS)
    params["rep_w"], params["rep_b"] = init_linear(keys[5], N_HIDDEN, Z_DIM)
    params["rec_w"], params["rec_b"] = init_linear(keys[6], Z_DIM, N_HIDDEN)
    disc_bound = 1.0 / math.sqrt(N_HIDDEN)
    params["disc_w"] = jax.random.uniform(
        keys[7], (N_HIDDEN, N_HIDDEN), jnp.float32, -disc_bound, disc_bound
    )

    prepare, forward = make_lg_vgae_forward(thetas, B)
    prepped, a_hat_bf16 = prepare(params, A_hat)   # one-time bf16 casts
    jax.block_until_ready(prepped)

    loss = forward(prepped, a_hat_bf16, features, keys[8])
    jax.block_until_ready(loss)
    assert jnp.isfinite(loss)
    # TODO(synk): v7x-only 2-TensorCore split (grid=(2,) over the pos/neg
    # encoder halves or pl.core_map) intentionally omitted; single fused
    # kernel is launch/latency-bound at N=32.
    # TODO(synk): for large N, restructure A_hat propagation as a node-tiled
    # grid (row-tiles of A_hat, k-reduction marked "arbitrary") to stay within
    # v7x's 64 MiB VMEM and restore DMA/compute overlap.
    print("KERNEL_OK")
</pallas_src>

<mosaic_0001>
module attributes {stable_mosaic.version = 11 : i64} {
  func.func @_fused_lg_vgae_kernel(%arg0: memref<64x16xf32, #tpu.memory_space<vmem>>, %arg1: memref<32x32xbf16, #tpu.memory_space<vmem>>, %arg2: memref<32x16xf32, #tpu.memory_space<vmem>>, %arg3: memref<16x32xbf16, #tpu.memory_space<vmem>>, %arg4: memref<1x32xf32, #tpu.memory_space<vmem>>, %arg5: memref<3x32x32xbf16, #tpu.memory_space<vmem>>, %arg6: memref<1x32xf32, #tpu.memory_space<vmem>>, %arg7: memref<32x16xbf16, #tpu.memory_space<vmem>>, %arg8: memref<1x16xf32, #tpu.memory_space<vmem>>, %arg9: memref<16x32xbf16, #tpu.memory_space<vmem>>, %arg10: memref<1x32xf32, #tpu.memory_space<vmem>>, %arg11: memref<32x16xbf16, #tpu.memory_space<vmem>>, %arg12: memref<1x16xf32, #tpu.memory_space<vmem>>, %arg13: memref<3x16x16xbf16, #tpu.memory_space<vmem>>, %arg14: memref<1x16xf32, #tpu.memory_space<vmem>>, %arg15: memref<32x32xbf16, #tpu.memory_space<vmem>>, %arg16: memref<1x1xf32, #tpu.memory_space<vmem>>) attributes {dimension_semantics = [], scalar_prefetch = 0 : i64, scratch_operands = 0 : i64, tpu.core_type = #tpu.core_type<tc>} {
    %c0 = arith.constant 0 : index
    %c0_0 = arith.constant 0 : index
    %0 = vector.load %arg0[%c0, %c0_0] : memref<64x16xf32, #tpu.memory_space<vmem>>, vector<64x16xf32>
    %c0_1 = arith.constant 0 : index
    %c0_2 = arith.constant 0 : index
    %1 = vector.load %arg1[%c0_1, %c0_2] : memref<32x32xbf16, #tpu.memory_space<vmem>>, vector<32x32xbf16>
    %c0_3 = arith.constant 0 : index
    %c0_4 = arith.constant 0 : index
    %2 = vector.load %arg3[%c0_3, %c0_4] : memref<16x32xbf16, #tpu.memory_space<vmem>>, vector<16x32xbf16>
    %3 = arith.truncf %0 : vector<64x16xf32> to vector<64x16xbf16>
    %cst = arith.constant dense<0.000000e+00> : vector<64x32xf32>
    %4 = tpu.matmul %3, %2, %cst {dimension_numbers = #tpu.dot_dimension_numbers<[1], [0], [0], [1], [0, 0, 1, 1], [], []>} : vector<64x16xbf16>, vector<16x32xbf16>, vector<64x32xf32> -> vector<64x32xf32>
    %c0_5 = arith.constant 0 : index
    %c0_6 = arith.constant 0 : index
    %5 = vector.load %arg4[%c0_5, %c0_6] : memref<1x32xf32, #tpu.memory_space<vmem>>, vector<1x32xf32>
    %6 = vector.broadcast %5 : vector<1x32xf32> to vector<64x32xf32>
    %7 = arith.addf %4, %6 : vector<64x32xf32>
    %cst_7 = arith.constant 0.000000e+00 : f32
    %8 = vector.broadcast %cst_7 : f32 to vector<64x32xf32>
    %9 = arith.maximumf %7, %8 : vector<64x32xf32>
    %10 = vector.extract_strided_slice %9 {offsets = [0, 0], sizes = [32, 32], strides = [1, 1]} : vector<64x32xf32> to vector<32x32xf32>
    %11 = vector.extract_strided_slice %9 {offsets = [32, 0], sizes = [32, 32], strides = [1, 1]} : vector<64x32xf32> to vector<32x32xf32>
    %cst_8 = arith.constant 3.000000e+00 : f32
    %12 = vector.broadcast %cst_8 : f32 to vector<32x32xf32>
    %13 = arith.mulf %12, %10 : vector<32x32xf32>
    %cst_9 = arith.constant 0.000000e+00 : f32
    %14 = vector.broadcast %cst_9 : f32 to vector<32x32xf32>
    %15 = arith.mulf %14, %10 : vector<32x32xf32>
    %cst_10 = arith.constant 0.000000e+00 : f32
    %16 = vector.broadcast %cst_10 : f32 to vector<32x32xf32>
    %17 = arith.mulf %16, %10 : vector<32x32xf32>
    %18 = arith.truncf %10 : vector<32x32xf32> to vector<32x32xbf16>
    %cst_11 = arith.constant dense<0.000000e+00> : vector<32x32xf32>
    %19 = tpu.matmul %1, %18, %cst_11 {dimension_numbers = #tpu.dot_dimension_numbers<[1], [0], [0], [1], [0, 0, 1, 1], [], []>} : vector<32x32xbf16>, vector<32x32xbf16>, vector<32x32xf32> -> vector<32x32xf32>
    %20 = arith.subf %10, %19 : vector<32x32xf32>
    %cst_12 = arith.constant -3.000000e+00 : f32
    %21 = vector.broadcast %cst_12 : f32 to vector<32x32xf32>
    %22 = arith.mulf %21, %20 : vector<32x32xf32>
    %23 = arith.addf %13, %22 : vector<32x32xf32>
    %cst_13 = arith.constant 3.000000e+00 : f32
    %24 = vector.broadcast %cst_13 : f32 to vector<32x32xf32>
    %25 = arith.mulf %24, %20 : vector<32x32xf32>
    %26 = arith.addf %15, %25 : vector<32x32xf32>
    %cst_14 = arith.constant 0.000000e+00 : f32
    %27 = vector.broadcast %cst_14 : f32 to vector<32x32xf32>
    %28 = arith.mulf %27, %20 : vector<32x32xf32>
    %29 = arith.addf %17, %28 : vector<32x32xf32>
    %30 = arith.truncf %20 : vector<32x32xf32> to vector<32x32xbf16>
    %cst_15 = arith.constant dense<0.000000e+00> : vector<32x32xf32>
    %31 = tpu.matmul %1, %30, %cst_15 {dimension_numbers = #tpu.dot_dimension_numbers<[1], [0], [0], [1], [0, 0, 1, 1], [], []>} : vector<32x32xbf16>, vector<32x32xbf16>, vector<32x32xf32> -> vector<32x32xf32>
    %32 = arith.subf %20, %31 : vector<32x32xf32>
    %cst_16 = arith.constant 7.500000e-01 : f32
    %33 = vector.broadcast %cst_16 : f32 to vector<32x32xf32>
    %34 = arith.mulf %33, %32 : vector<32x32xf32>
    %35 = arith.addf %23, %34 : vector<32x32xf32>
    %cst_17 = arith.constant -1.500000e+00 : f32
    %36 = vector.broadcast %cst_17 : f32 to vector<32x32xf32>
    %37 = arith.mulf %36, %32 : vector<32x32xf32>
    %38 = arith.addf %26, %37 : vector<32x32xf32>
    %cst_18 = arith.constant 7.500000e-01 : f32
    %39 = vector.broadcast %cst_18 : f32 to vector<32x32xf32>
    %40 = arith.mulf %39, %32 : vector<32x32xf32>
    %41 = arith.addf %29, %40 : vector<32x32xf32>
    %c0_19 = arith.constant 0 : index
    %c0_20 = arith.constant 0 : index
    %42 = vector.load %arg6[%c0_19, %c0_20] : memref<1x32xf32, #tpu.memory_space<vmem>>, vector<1x32xf32>
    %c0_21 = arith.constant 0 : index
    %c0_22 = arith.constant 0 : index
    %c0_23 = arith.constant 0 : index
    %43 = vector.load %arg5[%c0_21, %c0_22, %c0_23] : memref<3x32x32xbf16, #tpu.memory_space<vmem>>, vector<1x32x32xbf16>
    %44 = vector.shape_cast %43 : vector<1x32x32xbf16> to vector<32x32xbf16>
    %45 = arith.truncf %35 : vector<32x32xf32> to vector<32x32xbf16>
    %cst_24 = arith.constant dense<0.000000e+00> : vector<32x32xf32>
    %46 = tpu.matmul %45, %44, %cst_24 {dimension_numbers = #tpu.dot_dimension_numbers<[1], [0], [0], [1], [0, 0, 1, 1], [], []>} : vector<32x32xbf16>, vector<32x32xbf16>, vector<32x32xf32> -> vector<32x32xf32>
    %47 = vector.broadcast %42 : vector<1x32xf32> to vector<32x32xf32>
    %48 = arith.addf %47, %46 : vector<32x32xf32>
    %c1 = arith.constant 1 : index
    %c0_25 = arith.constant 0 : index
    %c0_26 = arith.constant 0 : index
    %49 = vector.load %arg5[%c1, %c0_25, %c0_26] : memref<3x32x32xbf16, #tpu.memory_space<vmem>>, vector<1x32x32xbf16>
    %50 = vector.shape_cast %49 : vector<1x32x32xbf16> to vector<32x32xbf16>
    %51 = arith.truncf %38 : vector<32x32xf32> to vector<32x32xbf16>
    %cst_27 = arith.constant dense<0.000000e+00> : vector<32x32xf32>
    %52 = tpu.matmul %51, %50, %cst_27 {dimension_numbers = #tpu.dot_dimension_numbers<[1], [0], [0], [1], [0, 0, 1, 1], [], []>} : vector<32x32xbf16>, vector<32x32xbf16>, vector<32x32xf32> -> vector<32x32xf32>
    %53 = arith.addf %48, %52 : vector<32x32xf32>
    %c2 = arith.constant 2 : index
    %c0_28 = arith.constant 0 : index
    %c0_29 = arith.constant 0 : index
    %54 = vector.load %arg5[%c2, %c0_28, %c0_29] : memref<3x32x32xbf16, #tpu.memory_space<vmem>>, vector<1x32x32xbf16>
    %55 = vector.shape_cast %54 : vector<1x32x32xbf16> to vector<32x32xbf16>
    %56 = arith.truncf %41 : vector<32x32xf32> to vector<32x32xbf16>
    %cst_30 = arith.constant dense<0.000000e+00> : vector<32x32xf32>
    %57 = tpu.matmul %56, %55, %cst_30 {dimension_numbers = #tpu.dot_dimension_numbers<[1], [0], [0], [1], [0, 0, 1, 1], [], []>} : vector<32x32xbf16>, vector<32x32xbf16>, vector<32x32xf32> -> vector<32x32xf32>
    %58 = arith.addf %53, %57 : vector<32x32xf32>
    %cst_31 = arith.constant 3.000000e+00 : f32
    %59 = vector.broadcast %cst_31 : f32 to vector<32x32xf32>
    %60 = arith.mulf %59, %11 : vector<32x32xf32>
    %cst_32 = arith.constant 0.000000e+00 : f32
    %61 = vector.broadcast %cst_32 : f32 to vector<32x32xf32>
    %62 = arith.mulf %61, %11 : vector<32x32xf32>
    %cst_33 = arith.constant 0.000000e+00 : f32
    %63 = vector.broadcast %cst_33 : f32 to vector<32x32xf32>
    %64 = arith.mulf %63, %11 : vector<32x32xf32>
    %65 = arith.truncf %11 : vector<32x32xf32> to vector<32x32xbf16>
    %cst_34 = arith.constant dense<0.000000e+00> : vector<32x32xf32>
    %66 = tpu.matmul %1, %65, %cst_34 {dimension_numbers = #tpu.dot_dimension_numbers<[1], [0], [0], [1], [0, 0, 1, 1], [], []>} : vector<32x32xbf16>, vector<32x32xbf16>, vector<32x32xf32> -> vector<32x32xf32>
    %67 = arith.subf %11, %66 : vector<32x32xf32>
    %cst_35 = arith.constant -3.000000e+00 : f32
    %68 = vector.broadcast %cst_35 : f32 to vector<32x32xf32>
    %69 = arith.mulf %68, %67 : vector<32x32xf32>
    %70 = arith.addf %60, %69 : vector<32x32xf32>
    %cst_36 = arith.constant 3.000000e+00 : f32
    %71 = vector.broadcast %cst_36 : f32 to vector<32x32xf32>
    %72 = arith.mulf %71, %67 : vector<32x32xf32>
    %73 = arith.addf %62, %72 : vector<32x32xf32>
    %cst_37 = arith.constant 0.000000e+00 : f32
    %74 = vector.broadcast %cst_37 : f32 to vector<32x32xf32>
    %75 = arith.mulf %74, %67 : vector<32x32xf32>
    %76 = arith.addf %64, %75 : vector<32x32xf32>
    %77 = arith.truncf %67 : vector<32x32xf32> to vector<32x32xbf16>
    %cst_38 = arith.constant dense<0.000000e+00> : vector<32x32xf32>
    %78 = tpu.matmul %1, %77, %cst_38 {dimension_numbers = #tpu.dot_dimension_numbers<[1], [0], [0], [1], [0, 0, 1, 1], [], []>} : vector<32x32xbf16>, vector<32x32xbf16>, vector<32x32xf32> -> vector<32x32xf32>
    %79 = arith.subf %67, %78 : vector<32x32xf32>
    %cst_39 = arith.constant 7.500000e-01 : f32
    %80 = vector.broadcast %cst_39 : f32 to vector<32x32xf32>
    %81 = arith.mulf %80, %79 : vector<32x32xf32>
    %82 = arith.addf %70, %81 : vector<32x32xf32>
    %cst_40 = arith.constant -1.500000e+00 : f32
    %83 = vector.broadcast %cst_40 : f32 to vector<32x32xf32>
    %84 = arith.mulf %83, %79 : vector<32x32xf32>
    %85 = arith.addf %73, %84 : vector<32x32xf32>
    %cst_41 = arith.constant 7.500000e-01 : f32
    %86 = vector.broadcast %cst_41 : f32 to vector<32x32xf32>
    %87 = arith.mulf %86, %79 : vector<32x32xf32>
    %88 = arith.addf %76, %87 : vector<32x32xf32>
    %c0_42 = arith.constant 0 : index
    %c0_43 = arith.constant 0 : index
    %89 = vector.load %arg6[%c0_42, %c0_43] : memref<1x32xf32, #tpu.memory_space<vmem>>, vector<1x32xf32>
    %c0_44 = arith.constant 0 : index
    %c0_45 = arith.constant 0 : index
    %c0_46 = arith.constant 0 : index
    %90 = vector.load %arg5[%c0_44, %c0_45, %c0_46] : memref<3x32x32xbf16, #tpu.memory_space<vmem>>, vector<1x32x32xbf16>
    %91 = vector.shape_cast %90 : vector<1x32x32xbf16> to vector<32x32xbf16>
    %92 = arith.truncf %82 : vector<32x32xf32> to vector<32x32xbf16>
    %cst_47 = arith.constant dense<0.000000e+00> : vector<32x32xf32>
    %93 = tpu.matmul %92, %91, %cst_47 {dimension_numbers = #tpu.dot_dimension_numbers<[1], [0], [0], [1], [0, 0, 1, 1], [], []>} : vector<32x32xbf16>, vector<32x32xbf16>, vector<32x32xf32> -> vector<32x32xf32>
    %94 = vector.broadcast %89 : vector<1x32xf32> to vector<32x32xf32>
    %95 = arith.addf %94, %93 : vector<32x32xf32>
    %c1_48 = arith.constant 1 : index
    %c0_49 = arith.constant 0 : index
    %c0_50 = arith.constant 0 : index
    %96 = vector.load %arg5[%c1_48, %c0_49, %c0_50] : memref<3x32x32xbf16, #tpu.memory_space<vmem>>, vector<1x32x32xbf16>
    %97 = vector.shape_cast %96 : vector<1x32x32xbf16> to vector<32x32xbf16>
    %98 = arith.truncf %85 : vector<32x32xf32> to vector<32x32xbf16>
    %cst_51 = arith.constant dense<0.000000e+00> : vector<32x32xf32>
    %99 = tpu.matmul %98, %97, %cst_51 {dimension_numbers = #tpu.dot_dimension_numbers<[1], [0], [0], [1], [0, 0, 1, 1], [], []>} : vector<32x32xbf16>, vector<32x32xbf16>, vector<32x32xf32> -> vector<32x32xf32>
    %100 = arith.addf %95, %99 : vector<32x32xf32>
    %c2_52 = arith.constant 2 : index
    %c0_53 = arith.constant 0 : index
    %c0_54 = arith.constant 0 : index
    %101 = vector.load %arg5[%c2_52, %c0_53, %c0_54] : memref<3x32x32xbf16, #tpu.memory_space<vmem>>, vector<1x32x32xbf16>
    %102 = vector.shape_cast %101 : vector<1x32x32xbf16> to vector<32x32xbf16>
    %103 = arith.truncf %88 : vector<32x32xf32> to vector<32x32xbf16>
    %cst_55 = arith.constant dense<0.000000e+00> : vector<32x32xf32>
    %104 = tpu.matmul %103, %102, %cst_55 {dimension_numbers = #tpu.dot_dimension_numbers<[1], [0], [0], [1], [0, 0, 1, 1], [], []>} : vector<32x32xbf16>, vector<32x32xbf16>, vector<32x32xf32> -> vector<32x32xf32>
    %105 = arith.addf %100, %104 : vector<32x32xf32>
    %cst_56 = arith.constant dense<0.000000e+00> : vector<32xf32>
    %106 = vector.multi_reduction <add>, %58, %cst_56 [0] : vector<32x32xf32> to vector<32xf32>
    %107 = vector.shape_cast %106 : vector<32xf32> to vector<1x32xf32>
    %cst_57 = arith.constant 3.200000e+01 : f32
    %108 = vector.broadcast %cst_57 : f32 to vector<1x32xf32>
    %109 = arith.divf %107, %108 : vector<1x32xf32>
    %110 = arith.negf %109 : vector<1x32xf32>
    %111 = math.exp %110 : vector<1x32xf32>
    %cst_58 = arith.constant 1.000000e+00 : f32
    %112 = vector.broadcast %cst_58 : f32 to vector<1x32xf32>
    %113 = arith.addf %112, %111 : vector<1x32xf32>
    %114 = arith.divf %112, %113 : vector<1x32xf32>
    %c0_59 = arith.constant 0 : index
    %c0_60 = arith.constant 0 : index
    %115 = vector.load %arg15[%c0_59, %c0_60] : memref<32x32xbf16, #tpu.memory_space<vmem>>, vector<32x32xbf16>
    %116 = arith.truncf %114 : vector<1x32xf32> to vector<1x32xbf16>
    %cst_61 = arith.constant dense<0.000000e+00> : vector<1x32xf32>
    %117 = tpu.matmul %116, %115, %cst_61 {dimension_numbers = #tpu.dot_dimension_numbers<[1], [0], [0], [1], [0, 0, 1, 1], [], []>} : vector<1x32xbf16>, vector<32x32xbf16>, vector<1x32xf32> -> vector<1x32xf32>
    %118 = vector.broadcast %117 : vector<1x32xf32> to vector<32x32xf32>
    %119 = arith.mulf %58, %118 : vector<32x32xf32>
    %cst_62 = arith.constant dense<0.000000e+00> : vector<32xf32>
    %120 = vector.multi_reduction <add>, %119, %cst_62 [1] : vector<32x32xf32> to vector<32xf32>
    %121 = vector.shape_cast %120 : vector<32xf32> to vector<32x1xf32>
    %122 = vector.broadcast %117 : vector<1x32xf32> to vector<32x32xf32>
    %123 = arith.mulf %105, %122 : vector<32x32xf32>
    %cst_63 = arith.constant dense<0.000000e+00> : vector<32xf32>
    %124 = vector.multi_reduction <add>, %123, %cst_63 [1] : vector<32x32xf32> to vector<32xf32>
    %125 = vector.shape_cast %124 : vector<32xf32> to vector<32x1xf32>
    %cst_64 = arith.constant 0.000000e+00 : f32
    %126 = vector.broadcast %cst_64 : f32 to vector<32x1xf32>
    %127 = arith.subf %126, %121 : vector<32x1xf32>
    %cst_65 = arith.constant 0.000000e+00 : f32
    %128 = vector.broadcast %cst_65 : f32 to vector<32x1xf32>
    %129 = arith.maximumf %127, %128 : vector<32x1xf32>
    %130 = math.absf %127 : vector<32x1xf32>
    %cst_66 = arith.constant 0.000000e+00 : f32
    %131 = vector.broadcast %cst_66 : f32 to vector<32x1xf32>
    %132 = arith.subf %131, %130 : vector<32x1xf32>
    %133 = math.exp %132 : vector<32x1xf32>
    %cst_67 = arith.constant 1.000000e+00 : f32
    %134 = vector.broadcast %cst_67 : f32 to vector<32x1xf32>
    %135 = arith.addf %134, %133 : vector<32x1xf32>
    %136 = math.log %135 : vector<32x1xf32>
    %137 = arith.addf %129, %136 : vector<32x1xf32>
    %138 = vector.shape_cast %137 : vector<32x1xf32> to vector<1x32x1xf32>
    %cst_68 = arith.constant dense<0.000000e+00> : vector<1xf32>
    %139 = vector.multi_reduction <add>, %138, %cst_68 [1, 2] : vector<1x32x1xf32> to vector<1xf32>
    %140 = vector.shape_cast %139 : vector<1xf32> to vector<1x1x1xf32>
    %141 = vector.extract %140[0, 0, 0] : f32 from vector<1x1x1xf32>
    %142 = vector.broadcast %141 : f32 to vector<1x1xf32>
    %cst_69 = arith.constant 0.000000e+00 : f32
    %143 = vector.broadcast %cst_69 : f32 to vector<32x1xf32>
    %144 = arith.maximumf %125, %143 : vector<32x1xf32>
    %145 = math.absf %125 : vector<32x1xf32>
    %cst_70 = arith.constant 0.000000e+00 : f32
    %146 = vector.broadcast %cst_70 : f32 to vector<32x1xf32>
    %147 = arith.subf %146, %145 : vector<32x1xf32>
    %148 = math.exp %147 : vector<32x1xf32>
    %cst_71 = arith.constant 1.000000e+00 : f32
    %149 = vector.broadcast %cst_71 : f32 to vector<32x1xf32>
    %150 = arith.addf %149, %148 : vector<32x1xf32>
    %151 = math.log %150 : vector<32x1xf32>
    %152 = arith.addf %144, %151 : vector<32x1xf32>
    %153 = vector.shape_cast %152 : vector<32x1xf32> to vector<1x32x1xf32>
    %cst_72 = arith.constant dense<0.000000e+00> : vector<1xf32>
    %154 = vector.multi_reduction <add>, %153, %cst_72 [1, 2] : vector<1x32x1xf32> to vector<1xf32>
    %155 = vector.shape_cast %154 : vector<1xf32> to vector<1x1x1xf32>
    %156 = vector.extract %155[0, 0, 0] : f32 from vector<1x1x1xf32>
    %157 = vector.broadcast %156 : f32 to vector<1x1xf32>
    %158 = arith.addf %142, %157 : vector<1x1xf32>
    %cst_73 = arith.constant 3.200000e+01 : f32
    %159 = vector.broadcast %cst_73 : f32 to vector<1x1xf32>
    %160 = arith.divf %158, %159 : vector<1x1xf32>
    %c0_74 = arith.constant 0 : index
    %c0_75 = arith.constant 0 : index
    %161 = vector.load %arg7[%c0_74, %c0_75] : memref<32x16xbf16, #tpu.memory_space<vmem>>, vector<32x16xbf16>
    %162 = arith.truncf %58 : vector<32x32xf32> to vector<32x32xbf16>
    %cst_76 = arith.constant dense<0.000000e+00> : vector<32x16xf32>
    %163 = tpu.matmul %162, %161, %cst_76 {dimension_numbers = #tpu.dot_dimension_numbers<[1], [0], [0], [1], [0, 0, 1, 1], [], []>} : vector<32x32xbf16>, vector<32x16xbf16>, vector<32x16xf32> -> vector<32x16xf32>
    %c0_77 = arith.constant 0 : index
    %c0_78 = arith.constant 0 : index
    %164 = vector.load %arg8[%c0_77, %c0_78] : memref<1x16xf32, #tpu.memory_space<vmem>>, vector<1x16xf32>
    %165 = vector.broadcast %164 : vector<1x16xf32> to vector<32x16xf32>
    %166 = arith.addf %163, %165 : vector<32x16xf32>
    %cst_79 = arith.constant 5.000000e-01 : f32
    %167 = vector.broadcast %cst_79 : f32 to vector<32x16xf32>
    %168 = arith.mulf %167, %166 : vector<32x16xf32>
    %169 = math.exp %168 : vector<32x16xf32>
    %c0_80 = arith.constant 0 : index
    %c0_81 = arith.constant 0 : index
    %170 = vector.load %arg2[%c0_80, %c0_81] : memref<32x16xf32, #tpu.memory_space<vmem>>, vector<32x16xf32>
    %171 = arith.mulf %170, %169 : vector<32x16xf32>
    %172 = arith.addf %166, %171 : vector<32x16xf32>
    %c0_82 = arith.constant 0 : index
    %c0_83 = arith.constant 0 : index
    %173 = vector.load %arg9[%c0_82, %c0_83] : memref<16x32xbf16, #tpu.memory_space<vmem>>, vector<16x32xbf16>
    %174 = arith.truncf %172 : vector<32x16xf32> to vector<32x16xbf16>
    %cst_84 = arith.constant dense<0.000000e+00> : vector<32x32xf32>
    %175 = tpu.matmul %174, %173, %cst_84 {dimension_numbers = #tpu.dot_dimension_numbers<[1], [0], [0], [1], [0, 0, 1, 1], [], []>} : vector<32x16xbf16>, vector<16x32xbf16>, vector<32x32xf32> -> vector<32x32xf32>
    %c0_85 = arith.constant 0 : index
    %c0_86 = arith.constant 0 : index
    %176 = vector.load %arg10[%c0_85, %c0_86] : memref<1x32xf32, #tpu.memory_space<vmem>>, vector<1x32xf32>
    %177 = vector.broadcast %176 : vector<1x32xf32> to vector<32x32xf32>
    %178 = arith.addf %175, %177 : vector<32x32xf32>
    %c0_87 = arith.constant 0 : index
    %c0_88 = arith.constant 0 : index
    %179 = vector.load %arg11[%c0_87, %c0_88] : memref<32x16xbf16, #tpu.memory_space<vmem>>, vector<32x16xbf16>
    %180 = arith.truncf %178 : vector<32x32xf32> to vector<32x32xbf16>
    %cst_89 = arith.constant dense<0.000000e+00> : vector<32x16xf32>
    %181 = tpu.matmul %180, %179, %cst_89 {dimension_numbers = #tpu.dot_dimension_numbers<[1], [0], [0], [1], [0, 0, 1, 1], [], []>} : vector<32x32xbf16>, vector<32x16xbf16>, vector<32x16xf32> -> vector<32x16xf32>
    %c0_90 = arith.constant 0 : index
    %c0_91 = arith.constant 0 : index
    %182 = vector.load %arg12[%c0_90, %c0_91] : memref<1x16xf32, #tpu.memory_space<vmem>>, vector<1x16xf32>
    %183 = vector.broadcast %182 : vector<1x16xf32> to vector<32x16xf32>
    %184 = arith.addf %181, %183 : vector<32x16xf32>
    %cst_92 = arith.constant 0.000000e+00 : f32
    %185 = vector.broadcast %cst_92 : f32 to vector<32x16xf32>
    %186 = arith.maximumf %184, %185 : vector<32x16xf32>
    %cst_93 = arith.constant 3.000000e+00 : f32
    %187 = vector.broadcast %cst_93 : f32 to vector<32x16xf32>
    %188 = arith.mulf %187, %186 : vector<32x16xf32>
    %cst_94 = arith.constant 0.000000e+00 : f32
    %189 = vector.broadcast %cst_94 : f32 to vector<32x16xf32>
    %190 = arith.mulf %189, %186 : vector<32x16xf32>
    %cst_95 = arith.constant 0.000000e+00 : f32
    %191 = vector.broadcast %cst_95 : f32 to vector<32x16xf32>
    %192 = arith.mulf %191, %186 : vector<32x16xf32>
    %193 = arith.truncf %186 : vector<32x16xf32> to vector<32x16xbf16>
    %cst_96 = arith.constant dense<0.000000e+00> : vector<32x16xf32>
    %194 = tpu.matmul %1, %193, %cst_96 {dimension_numbers = #tpu.dot_dimension_numbers<[1], [0], [0], [1], [0, 0, 1, 1], [], []>} : vector<32x32xbf16>, vector<32x16xbf16>, vector<32x16xf32> -> vector<32x16xf32>
    %195 = arith.subf %186, %194 : vector<32x16xf32>
    %cst_97 = arith.constant -3.000000e+00 : f32
    %196 = vector.broadcast %cst_97 : f32 to vector<32x16xf32>
    %197 = arith.mulf %196, %195 : vector<32x16xf32>
    %198 = arith.addf %188, %197 : vector<32x16xf32>
    %cst_98 = arith.constant 3.000000e+00 : f32
    %199 = vector.broadcast %cst_98 : f32 to vector<32x16xf32>
    %200 = arith.mulf %199, %195 : vector<32x16xf32>
    %201 = arith.addf %190, %200 : vector<32x16xf32>
    %cst_99 = arith.constant 0.000000e+00 : f32
    %202 = vector.broadcast %cst_99 : f32 to vector<32x16xf32>
    %203 = arith.mulf %202, %195 : vector<32x16xf32>
    %204 = arith.addf %192, %203 : vector<32x16xf32>
    %205 = arith.truncf %195 : vector<32x16xf32> to vector<32x16xbf16>
    %cst_100 = arith.constant dense<0.000000e+00> : vector<32x16xf32>
    %206 = tpu.matmul %1, %205, %cst_100 {dimension_numbers = #tpu.dot_dimension_numbers<[1], [0], [0], [1], [0, 0, 1, 1], [], []>} : vector<32x32xbf16>, vector<32x16xbf16>, vector<32x16xf32> -> vector<32x16xf32>
    %207 = arith.subf %195, %206 : vector<32x16xf32>
    %cst_101 = arith.constant 7.500000e-01 : f32
    %208 = vector.broadcast %cst_101 : f32 to vector<32x16xf32>
    %209 = arith.mulf %208, %207 : vector<32x16xf32>
    %210 = arith.addf %198, %209 : vector<32x16xf32>
    %cst_102 = arith.constant -1.500000e+00 : f32
    %211 = vector.broadcast %cst_102 : f32 to vector<32x16xf32>
    %212 = arith.mulf %211, %207 : vector<32x16xf32>
    %213 = arith.addf %201, %212 : vector<32x16xf32>
    %cst_103 = arith.constant 7.500000e-01 : f32
    %214 = vector.broadcast %cst_103 : f32 to vector<32x16xf32>
    %215 = arith.mulf %214, %207 : vector<32x16xf32>
    %216 = arith.addf %204, %215 : vector<32x16xf32>
    %c0_104 = arith.constant 0 : index
    %c0_105 = arith.constant 0 : index
    %217 = vector.load %arg14[%c0_104, %c0_105] : memref<1x16xf32, #tpu.memory_space<vmem>>, vector<1x16xf32>
    %c0_106 = arith.constant 0 : index
    %c0_107 = arith.constant 0 : index
    %c0_108 = arith.constant 0 : index
    %218 = vector.load %arg13[%c0_106, %c0_107, %c0_108] : memref<3x16x16xbf16, #tpu.memory_space<vmem>>, vector<1x16x16xbf16>
    %219 = vector.shape_cast %218 : vector<1x16x16xbf16> to vector<16x16xbf16>
    %220 = arith.truncf %210 : vector<32x16xf32> to vector<32x16xbf16>
    %cst_109 = arith.constant dense<0.000000e+00> : vector<32x16xf32>
    %221 = tpu.matmul %220, %219, %cst_109 {dimension_numbers = #tpu.dot_dimension_numbers<[1], [0], [0], [1], [0, 0, 1, 1], [], []>} : vector<32x16xbf16>, vector<16x16xbf16>, vector<32x16xf32> -> vector<32x16xf32>
    %222 = vector.broadcast %217 : vector<1x16xf32> to vector<32x16xf32>
    %223 = arith.addf %222, %221 : vector<32x16xf32>
    %c1_110 = arith.constant 1 : index
    %c0_111 = arith.constant 0 : index
    %c0_112 = arith.constant 0 : index
    %224 = vector.load %arg13[%c1_110, %c0_111, %c0_112] : memref<3x16x16xbf16, #tpu.memory_space<vmem>>, vector<1x16x16xbf16>
    %225 = vector.shape_cast %224 : vector<1x16x16xbf16> to vector<16x16xbf16>
    %226 = arith.truncf %213 : vector<32x16xf32> to vector<32x16xbf16>
    %cst_113 = arith.constant dense<0.000000e+00> : vector<32x16xf32>
    %227 = tpu.matmul %226, %225, %cst_113 {dimension_numbers = #tpu.dot_dimension_numbers<[1], [0], [0], [1], [0, 0, 1, 1], [], []>} : vector<32x16xbf16>, vector<16x16xbf16>, vector<32x16xf32> -> vector<32x16xf32>
    %228 = arith.addf %223, %227 : vector<32x16xf32>
    %c2_114 = arith.constant 2 : index
    %c0_115 = arith.constant 0 : index
    %c0_116 = arith.constant 0 : index
    %229 = vector.load %arg13[%c2_114, %c0_115, %c0_116] : memref<3x16x16xbf16, #tpu.memory_space<vmem>>, vector<1x16x16xbf16>
    %230 = vector.shape_cast %229 : vector<1x16x16xbf16> to vector<16x16xbf16>
    %231 = arith.truncf %216 : vector<32x16xf32> to vector<32x16xbf16>
    %cst_117 = arith.constant dense<0.000000e+00> : vector<32x16xf32>
    %232 = tpu.matmul %231, %230, %cst_117 {dimension_numbers = #tpu.dot_dimension_numbers<[1], [0], [0], [1], [0, 0, 1, 1], [], []>} : vector<32x16xbf16>, vector<16x16xbf16>, vector<32x16xf32> -> vector<32x16xf32>
    %233 = arith.addf %228, %232 : vector<32x16xf32>
    %234 = vector.extract_strided_slice %0 {offsets = [0, 0], sizes = [32, 16], strides = [1, 1]} : vector<64x16xf32> to vector<32x16xf32>
    %235 = arith.subf %233, %234 : vector<32x16xf32>
    %236 = arith.mulf %235, %235 : vector<32x16xf32>
    %237 = vector.shape_cast %236 : vector<32x16xf32> to vector<1x32x16xf32>
    %cst_118 = arith.constant dense<0.000000e+00> : vector<1xf32>
    %238 = vector.multi_reduction <add>, %237, %cst_118 [1, 2] : vector<1x32x16xf32> to vector<1xf32>
    %239 = vector.shape_cast %238 : vector<1xf32> to vector<1x1x1xf32>
    %240 = vector.extract %239[0, 0, 0] : f32 from vector<1x1x1xf32>
    %241 = vector.broadcast %240 : f32 to vector<1x1xf32>
    %cst_119 = arith.constant 1.000000e+00 : f32
    %242 = vector.broadcast %cst_119 : f32 to vector<32x16xf32>
    %243 = arith.addf %242, %166 : vector<32x16xf32>
    %244 = arith.mulf %166, %166 : vector<32x16xf32>
    %245 = arith.subf %243, %244 : vector<32x16xf32>
    %246 = math.exp %166 : vector<32x16xf32>
    %247 = arith.subf %245, %246 : vector<32x16xf32>
    %248 = vector.shape_cast %247 : vector<32x16xf32> to vector<1x32x16xf32>
    %cst_120 = arith.constant dense<0.000000e+00> : vector<1xf32>
    %249 = vector.multi_reduction <add>, %248, %cst_120 [1, 2] : vector<1x32x16xf32> to vector<1xf32>
    %250 = vector.shape_cast %249 : vector<1xf32> to vector<1x1x1xf32>
    %251 = vector.extract %250[0, 0, 0] : f32 from vector<1x1x1xf32>
    %252 = vector.broadcast %251 : f32 to vector<1x1xf32>
    %cst_121 = arith.constant -5.000000e-01 : f32
    %253 = vector.broadcast %cst_121 : f32 to vector<1x1xf32>
    %254 = arith.mulf %253, %252 : vector<1x1xf32>
    %255 = arith.addf %241, %254 : vector<1x1xf32>
    %cst_122 = arith.constant 2.000000e-01 : f32
    %256 = vector.broadcast %cst_122 : f32 to vector<1x1xf32>
    %257 = arith.mulf %256, %255 : vector<1x1xf32>
    %cst_123 = arith.constant 8.000000e-01 : f32
    %258 = vector.broadcast %cst_123 : f32 to vector<1x1xf32>
    %259 = arith.mulf %258, %255 : vector<1x1xf32>
    %260 = arith.addf %257, %259 : vector<1x1xf32>
    %cst_124 = arith.constant 0.000000e+00 : f32
    %261 = vector.broadcast %cst_124 : f32 to vector<1x1xf32>
    %262 = arith.mulf %261, %160 : vector<1x1xf32>
    %263 = arith.addf %260, %262 : vector<1x1xf32>
    %c0_125 = arith.constant 0 : index
    %c0_126 = arith.constant 0 : index
    %264 = vector.load %arg16[%c0_125, %c0_126] : memref<1x1xf32, #tpu.memory_space<vmem>>, vector<1x1xf32>
    tpu.vector_store %arg16[%c0_125, %c0_126], %263 {strides = array<i32>} : memref<1x1xf32, #tpu.memory_space<vmem>>, vector<1x1xf32>,
    return
  }
}

</mosaic_0001>

<bundles_post_ra>
// kernel: forward.1
= control target key start
LH: loop header
LB: loop body
LE: loop exit
PB: predicated region body
PF: predicated region fallthrough
CT: control target
= control target key end

     0   :  { %s2870_s0 = inlined_call_operand.vmem [shape: f32[64,16], index: 0, kind: input, shape index: {}]   ;;  %s2871_s1 = inlined_call_operand.vmem [shape: bf16[32,32], index: 1, kind: input, shape index: {}]   ;;  %s2872_s2 = inlined_call_operand.vmem [shape: f32[32,16], index: 2, kind: input, shape index: {}]   ;;  %s2873_s3 = inlined_call_operand.vmem [shape: bf16[16,32], index: 3, kind: input, shape index: {}]   ;;  %s2874_s4 = inlined_call_operand.vmem [shape: f32[1,32], index: 4, kind: input, shape index: {}]   ;;  %s2875_s5 = inlined_call_operand.vmem [shape: bf16[3,32,32], index: 5, kind: input, shape index: {}]   ;;  %s2876_s6 = inlined_call_operand.vmem [shape: f32[1,32], index: 6, kind: input, shape index: {}]   ;;  %s2877_s7 = inlined_call_operand.vmem [shape: bf16[32,16], index: 7, kind: input, shape index: {}]   ;;  %s2878_s8 = inlined_call_operand.vmem [shape: f32[1,16], index: 8, kind: input, shape index: {}]   ;;  %s2879_s9 = inlined_call_operand.vmem [shape: bf16[16,32], index: 9, kind: input, shape index: {}]   ;;  %s2880_s10 = inlined_call_operand.vmem [shape: f32[1,32], index: 10, kind: input, shape index: {}]   ;;  %s2881_s11 = inlined_call_operand.vmem [shape: bf16[32,16], index: 11, kind: input, shape index: {}]   ;;  %s2882_s12 = inlined_call_operand.vmem [shape: f32[1,16], index: 12, kind: input, shape index: {}]   ;;  %s2883_s13 = inlined_call_operand.vmem [shape: bf16[3,16,16], index: 13, kind: input, shape index: {}]   ;;  %s2884_s14 = inlined_call_operand.vmem [shape: f32[1,16], index: 14, kind: input, shape index: {}]   ;;  %s2885_s15 = inlined_call_operand.vmem [shape: bf16[32,32], index: 15, kind: input, shape index: {}]   ;;  %s2886_s16 = inlined_call_operand.hbm [shape: f32[1,1], index: 16, kind: output, shape index: {}]  }
   0x1   :  { %2888 = sst [smem:[#allocation5_spill]] %s2870_s0 }
   0x2   :  { %v2249_v0 = vld [vmem:[%s2873_s3] sm:$0xff]   ;;  %s2889_s25 = sld [smem:[#allocation5_spill]]  ;;  %vm86_vm0 = vcmask 130048  }
   0x3   :  { %2048 = vmatprep.subr.bf16.mxu1 %v2249_v0 }
   0x4   :  { %2049 = vmatpush3.bf16.msra.mxu1 %v2249_v0 }
   0x8   :  { %v55_v1 = vld [vmem:[%s2889_s25] sm:$0xff]  ;;  %v56_v2 = vld [vmem:[%s2889_s25 + $0x8] sm:$0xff]  ;;  %v57_v3 = vld [vmem:[%s2889_s25 + $0x10] sm:$0xff] }
   0x9   :  { %v69_v4 = vpack.c.bf16 %v56_v2, %v55_v1  ;;  %v58_v5 = vld [vmem:[%s2889_s25 + $0x18] sm:$0xff] }
   0xa   :  { %v70_v6 = vpack.c.bf16 %v58_v5, %v57_v3 }
   0xb   :  { %2050 = vmatprep.mubr.msk.bf16.mxu1 %vm86_vm0, %v69_v4 }
   0xc   :  { %2051 = vmatmul.mubr.msk.bf16.vlgmr.msra.gmra.mrb[0].mxu1 %vm86_vm0, %v70_v6 }
   0xd   :  { %21 = vsyncpa [#allocation3], 0  ;;  %v59_v7 = vld [vmem:[%s2889_s25 + $0x20] sm:$0xff]  ;;  %v60_v8 = vld [vmem:[%s2889_s25 + $0x28] sm:$0xff]  ;;  %vm192_vm1 = vcmask 261120   ;;  %vm2351_vm2 = vmmov 0  }
   0xe   :  { %v71_v9 = vpack.c.bf16 %v60_v8, %v59_v7  ;;  %v61_v10 = vld [vmem:[%s2889_s25 + $0x30] sm:$0xff]  ;;  %v62_v11 = vld [vmem:[%s2889_s25 + $0x38] sm:$0xff]  ;;  %v2472_v13 = vld [vmem:[%s2871_s1] sm:$0xff]   ;;  %vm1093_vm3 = vcmask 7168   ;;  %s2352_s27 = smov [#allocation2]   ;;  %vm1877_vm4 = vcmask 0  }
   0xf   :  { %v72_v12 = vpack.c.bf16 %v62_v11, %v61_v10  ;;  %v1893_v14 = vld [vmem:[%s2874_s4] ss:$0 sm:$0xff]  ;;  %v2491_v29 = vld [vmem:[%s2871_s1 + $0x8] sm:$0xff]   ;;  %v2543_v56 = vld [vmem:[%s2875_s5 + $0x10] sm:$0xff]   ;;  %s1885_s28 = sshll.u32 %s2352_s27, 4  ;;  %s1886_s28 = int_to_ptr.vmem [resolvable:$true] %s1885_s28 }
  0x10   :  { %2054 = vmatprep.mubr.msk.bf16.mxu1 %vm86_vm0, %v71_v9  ;;  %v2529_v54 = vld [vmem:[%s2875_s5] sm:$0xff]   ;;  %v2536_v55 = vld [vmem:[%s2875_s5 + $0x8] sm:$0xff]   ;;  %s2330_s4 = scalar_lea.vmem %s1886_s28, 32  ;;  %p2331_p1 = scmp.lt.s32.totalorder %s1886_s28, %s1886_s28 }
  0x11   :  { %2074 = vmatprep.subr.bf16.mxu0 %v2529_v54 }
  0x12   :  { %2075 = vmatpush3.bf16.msra.mxu0 %v2529_v54 }
  0x13   :  { %2076 = vmatprep.subr.bf16.mxu0 %v2536_v55 }
  0x14   :  { %2055 = vmatmul.mubr.msk.bf16.gmra.mrb[4].mxu1 %vm86_vm0, %v72_v12 }
  0x15   :  { %2062 = vmatprep.mubr.msk.bf16.mxu1 %vm192_vm1, %v2472_v13 }
  0x16   :  { %2077 = vmatpush3.bf16.msra.mxu0 %v2536_v55 }
  0x17   :  { %2082 = vmatprep.subr.bf16.mxu0 %v2543_v56 }
  0xdf   :  { %v2052_v15 = vpop.f32.mrb[0].mxu1 }
  0xe0   :  { %v133_v16 = vpop.f32.mrb[1].mxu1  ;;  %v142_v21 = vadd.f32 %v2052_v15, %v1893_v14 }
  0xe1   :  { %v134_v17 = vadd.f32 %v1893_v14, %v133_v16  ;;  %v2053_v18 = vpop.f32.mrb[2].mxu1 }
  0xe2   :  { %v145_v19 = vadd.f32 %v2053_v18, %v1893_v14  ;;  %v136_v20 = vpop.f32.mrb[3].mxu1  ;;  %v166_v26 = vmax.f32 %v142_v21, 0.0 }
  0xe3   :  { %v137_v22 = vadd.f32 %v1893_v14, %v136_v20  ;;  %v2479_v23 = vmax.f32 %v134_v17, 0.0 }
  0xe4   :  { %v2481_v24 = vmax.f32 %v145_v19, 0.0  ;;  %v174_v57 = vmul.f32 3.0, %v166_v26  ;;  %v178_v59 = vmul.f32 0.0, %v166_v26 }
  0xe5   :  { %v2483_v25 = vmax.f32 %v137_v22, 0.0  ;;  %v176_v62 = vmul.f32 0.0, %v2479_v23  ;;  %v172_v2 = vmul.f32 3.0, %v2479_v23 }
  0xe6   :  { %v181_v28 = vpack.c.bf16 %v2481_v24, %v166_v26  ;;  %v175_v1 = vmul.f32 3.0, %v2481_v24  ;;  %v179_v3 = vmul.f32 0.0, %v2481_v24 }
  0xe7   :  { %v180_v27 = vpack.c.bf16 %v2483_v25, %v2479_v23  ;;  %v2056_v30 = vpop.f32.mrb[4].mxu1  ;;  %v177_v9 = vmul.f32 0.0, %v2483_v25  ;;  %v173_v10 = vmul.f32 3.0, %v2483_v25 }
  0xe8   :  { %v149_v31 = vpop.f32.mrb[5].mxu1  ;;  %v158_v45 = vadd.f32 %v2056_v30, %v1893_v14 }
  0xe9   :  { %2058 = vmatprep.subr.bf16.mxu1 %v180_v27  ;;  %v2057_v32 = vpop.f32.mrb[6].mxu1  ;;  %v150_v37 = vadd.f32 %v1893_v14, %v149_v31 }
  0xea   :  { %2059 = vmatpush3.bf16.msra.mxu1 %v180_v27  ;;  %v152_v33 = vpop.f32.mrb[7].mxu1  ;;  %v161_v47 = vadd.f32 %v2057_v32, %v1893_v14  ;;  %v2510_v50 = vmax.f32 %v158_v45, 0.0 }
  0xeb   :  { %2060 = vmatprep.subr.bf16.mxu1 %v181_v28  ;;  %v153_v39 = vadd.f32 %v1893_v14, %v152_v33  ;;  %v2505_v46 = vmax.f32 %v150_v37, 0.0 }
  0xec   :  { %v2512_v51 = vmax.f32 %v161_v47, 0.0 }
  0xed   :  { %v2507_v48 = vmax.f32 %v153_v39, 0.0 }
  0xee   :  { %2061 = vmatpush3.bf16.msra.mxu1 %v181_v28  ;;  %v600_v53 = vpack.c.bf16 %v2512_v51, %v2510_v50 }
  0xef   :  { %v599_v52 = vpack.c.bf16 %v2507_v48, %v2505_v46 }
  0xf1   :  { %2063 = vmatmul.mubr.msk.bf16.vlgmr.msra.gmra.mrb[8].mxu1 %vm192_vm1, %v2491_v29 }
  0xf2   :  { %2070 = vmatprep.mubr.msk.bf16.mxu1 %vm192_vm1, %v2472_v13 }
 0x1c4   :  { %v2064_v34 = vpop.f32.mrb[8].mxu1 }
 0x1c5   :  { %v233_v35 = vpop.f32.mrb[9].mxu1  ;;  %v250_v43 = vsub.f32 %v166_v26, %v2064_v34 }
 0x1c6   :  { %v2065_v36 = vpop.f32.mrb[10].mxu1  ;;  %v248_v40 = vsub.f32 %v2479_v23, %v233_v35 }
 0x1c7   :  { %v236_v38 = vpop.f32.mrb[11].mxu1  ;;  %v2499_v41 = vsub.f32 %v2481_v24, %v2065_v36  ;;  %v254_v58 = vmul.f32 -3.0, %v250_v43  ;;  %v262_v60 = vmul.f32 3.0, %v250_v43  ;;  %v270_v61 = vmul.f32 0.0, %v250_v43 }
 0x1c8   :  { %v2502_v42 = vsub.f32 %v2483_v25, %v236_v38  ;;  %v260_v63 = vmul.f32 3.0, %v248_v40  ;;  %v268_v0 = vmul.f32 0.0, %v248_v40  ;;  %v252_v6 = vmul.f32 -3.0, %v248_v40 }
 0x1c9   :  { %v277_v49 = vpack.c.bf16 %v2499_v41, %v250_v43  ;;  %v255_v4 = vmul.f32 -3.0, %v2499_v41  ;;  %v263_v5 = vmul.f32 3.0, %v2499_v41  ;;  %v258_v7 = vadd.f32 %v254_v58, %v174_v57 }
 0x1ca   :  { %v276_v44 = vpack.c.bf16 %v2502_v42, %v248_v40  ;;  %v271_v8 = vmul.f32 0.0, %v2499_v41  ;;  %v266_v11 = vadd.f32 %v262_v60, %v178_v59  ;;  %v274_v12 = vadd.f32 %v270_v61, %v178_v59 }
 0x1cb   :  { %v261_v15 = vmul.f32 3.0, %v2502_v42  ;;  %v269_v16 = vmul.f32 0.0, %v2502_v42  ;;  %v264_v18 = vadd.f32 %v260_v63, %v176_v62  ;;  %v272_v19 = vadd.f32 %v268_v0, %v176_v62 }
 0x1cc   :  { %2066 = vmatprep.subr.bf16.mxu1 %v276_v44  ;;  %v253_v21 = vmul.f32 -3.0, %v2502_v42  ;;  %v259_v23 = vadd.f32 %v255_v4, %v175_v1  ;;  %v267_v24 = vadd.f32 %v263_v5, %v179_v3  ;;  %v256_v27 = vadd.f32 %v252_v6, %v172_v2 }
 0x1cd   :  { %2067 = vmatpush3.bf16.msra.mxu1 %v276_v44  ;;  %v275_v30 = vadd.f32 %v271_v8, %v179_v3  ;;  %v265_v34 = vadd.f32 %v261_v15, %v177_v9  ;;  %v273_v35 = vadd.f32 %v269_v16, %v177_v9  ;;  %v2563_v8 = vld [vmem:[%s2875_s5 + $0x18] sm:$0xff]   ;;  %v2585_v15 = vld [vmem:[%s2875_s5 + $0x20] sm:$0xff]  }
 0x1ce   :  { %2068 = vmatprep.subr.bf16.mxu1 %v277_v49 }
 0x1d1   :  { %2069 = vmatpush3.bf16.msra.mxu1 %v277_v49 }
 0x1d2   :  { %2098 = vmatprep.subr.bf16.mxu1 %v599_v52 }
 0x1d4   :  { %2071 = vmatmul.mubr.msk.bf16.vlgmr.msra.gmra.mrb[12].mxu1 %vm192_vm1, %v2491_v29 }
 0x1d5   :  { %2099 = vmatpush3.bf16.msra.mxu1 %v599_v52  ;;  %2102 = vmatprep.mubr.msk.bf16.mxu1 %vm192_vm1, %v2472_v13 }
 0x1d6   :  { %2100 = vmatprep.subr.bf16.mxu1 %v600_v53 }
 0x1d9   :  { %2101 = vmatpush3.bf16.msra.mxu1 %v600_v53 }
 0x1dc   :  { %2103 = vmatmul.mubr.msk.bf16.vlgmr.msra.gmra.mrb[16].mxu1 %vm192_vm1, %v2491_v29 }
 0x1dd   :  { %2110 = vmatprep.mubr.msk.bf16.mxu1 %vm192_vm1, %v2472_v13 }
 0x2a7   :  { %v2072_v14 = vpop.f32.mrb[12].mxu1 }
 0x2a8   :  { %v329_v17 = vsub.f32 %v250_v43, %v2072_v14  ;;  %v312_v20 = vpop.f32.mrb[13].mxu1  ;;  %v257_v43 = vadd.f32 %v253_v21, %v173_v10 }
 0x2a9   :  { %v327_v22 = vsub.f32 %v248_v40, %v312_v20  ;;  %v2073_v26 = vpop.f32.mrb[14].mxu1 }
 0x2aa   :  { %v333_v28 = vmul.f32 0.75, %v329_v17  ;;  %v341_v25 = vmul.f32 -1.5, %v329_v17  ;;  %v330_v31 = vsub.f32 %v2499_v41, %v2073_v26  ;;  %v315_v32 = vpop.f32.mrb[15].mxu1  ;;  %v2594_v17 = vld [vmem:[%s2875_s5 + $0x28] sm:$0xff]   ;;  %v591_v26 = vmul.f32 3.0, %v2505_v46 }
 0x2ab   :  { %v331_v33 = vmul.f32 0.75, %v327_v22  ;;  %v328_v36 = vsub.f32 %v2502_v42, %v315_v32  ;;  %v339_v38 = vmul.f32 -1.5, %v327_v22 }
 0x2ac   :  { %v337_v37 = vadd.f32 %v333_v28, %v258_v7  ;;  %v334_v39 = vmul.f32 0.75, %v330_v31  ;;  %v345_v40 = vadd.f32 %v341_v25, %v266_v11  ;;  %v349_v44 = vadd.f32 %v333_v28, %v274_v12 }
 0x2ad   :  { %v342_v45 = vmul.f32 -1.5, %v330_v31  ;;  %v332_v47 = vmul.f32 0.75, %v328_v36  ;;  %v347_v49 = vadd.f32 %v331_v33, %v272_v19  ;;  %v340_v57 = vmul.f32 -1.5, %v328_v36 }
 0x2ae   :  { %v338_v52 = vadd.f32 %v334_v39, %v259_v23  ;;  %v350_v53 = vadd.f32 %v334_v39, %v275_v30  ;;  %v335_v60 = vadd.f32 %v331_v33, %v256_v27  ;;  %v343_v62 = vadd.f32 %v339_v38, %v264_v18  ;;  %v2259_v18 = vld [vmem:[%s2885_s15 + $0x8] sm:$0xff]  }
 0x2af   :  { %v346_v58 = vadd.f32 %v342_v45, %v267_v24  ;;  %v348_v41 = vadd.f32 %v332_v47, %v273_v35  ;;  %v2104_v59 = vpop.f32.mrb[16].mxu1  ;;  %v336_v61 = vadd.f32 %v332_v47, %v257_v43  ;;  %v344_v0 = vadd.f32 %v340_v57, %v265_v34 }
 0x2b0   :  { %v357_v63 = vpack.c.bf16 %v338_v52, %v337_v37  ;;  %v519_v42 = vpack.c.bf16 %v350_v53, %v349_v44  ;;  %v635_v1 = vpop.f32.mrb[17].mxu1  ;;  %v652_v12 = vsub.f32 %v2510_v50, %v2104_v59  ;;  %v593_v23 = vmul.f32 3.0, %v2510_v50 }
 0x2b1   :  { %v441_v2 = vpack.c.bf16 %v346_v58, %v345_v40  ;;  %v518_v3 = vpack.c.bf16 %v348_v41, %v347_v49  ;;  %v2105_v4 = vpop.f32.mrb[18].mxu1  ;;  %v356_v5 = vpack.c.bf16 %v336_v61, %v335_v60  ;;  %v440_v6 = vpack.c.bf16 %v344_v0, %v343_v62 }
 0x2b2   :  { %v638_v7 = vpop.f32.mrb[19].mxu1  ;;  %v2566_v9 = vsub.f32 %v2505_v46, %v635_v1  ;;  %v2569_v10 = vsub.f32 %v2512_v51, %v2105_v4  ;;  %v656_v19 = vmul.f32 -3.0, %v652_v12  ;;  %v664_v20 = vmul.f32 3.0, %v652_v12 }
 0x2b3   :  { %v2572_v11 = vsub.f32 %v2507_v48, %v638_v7  ;;  %2078 = vmatprep.mubr.msk.bf16.mxu0 %vm192_vm1, %v356_v5  ;;  %v672_v21 = vmul.f32 0.0, %v652_v12  ;;  %v597_v24 = vmul.f32 0.0, %v2510_v50  ;;  %v595_v27 = vmul.f32 0.0, %v2505_v46 }
 0x2b4   :  { %2079 = vmatmul.mubr.msk.bf16.vlgmr.msra.gmra.mrb[0].mxu0 %vm192_vm1, %v357_v63  ;;  %v679_v16 = vpack.c.bf16 %v2569_v10, %v652_v12  ;;  %v654_v22 = vmul.f32 -3.0, %v2566_v9  ;;  %v662_v28 = vmul.f32 3.0, %v2566_v9  ;;  %v670_v25 = vmul.f32 0.0, %v2566_v9 }
 0x2b5   :  { %2086 = vmatprep.mubr.msk.bf16.mxu0 %vm192_vm1, %v440_v6  ;;  %v678_v14 = vpack.c.bf16 %v2572_v11, %v2566_v9  ;;  %2083 = vmatpush3.bf16.msra.mxu0 %v2543_v56  ;;  %v594_v30 = vmul.f32 3.0, %v2512_v51  ;;  %v598_v31 = vmul.f32 0.0, %v2512_v51  ;;  %v657_v32 = vmul.f32 -3.0, %v2569_v10 }
 0x2b6   :  { %2084 = vmatprep.subr.bf16.mxu0 %v2563_v8  ;;  %v665_v33 = vmul.f32 3.0, %v2569_v10  ;;  %v592_v34 = vmul.f32 3.0, %v2507_v48  ;;  %v596_v50 = vmul.f32 0.0, %v2507_v48  ;;  %v660_v35 = vadd.f32 %v656_v19, %v593_v23 }
 0x2b7   :  { %2106 = vmatprep.subr.bf16.mxu1 %v678_v14  ;;  %v668_v36 = vadd.f32 %v664_v20, %v597_v24  ;;  %v676_v37 = vadd.f32 %v672_v21, %v597_v24  ;;  %v658_v38 = vadd.f32 %v654_v22, %v591_v26  ;;  %v673_v40 = vmul.f32 0.0, %v2569_v10 }
 0x2b8   :  { %2107 = vmatpush3.bf16.msra.mxu1 %v678_v14  ;;  %v655_v44 = vmul.f32 -3.0, %v2572_v11  ;;  %v663_v51 = vmul.f32 3.0, %v2572_v11  ;;  %v666_v45 = vadd.f32 %v662_v28, %v595_v27  ;;  %v674_v47 = vadd.f32 %v670_v25, %v595_v27  ;;  %v2643_v28 = vld [vmem:[%s2876_s6] ss:$0 sm:$0xff] }
 0x2b9   :  { %2108 = vmatprep.subr.bf16.mxu1 %v679_v16  ;;  %2085 = vmatpush3.bf16.msra.mxu0 %v2563_v8  ;;  %v671_v48 = vmul.f32 0.0, %v2572_v11  ;;  %v661_v57 = vadd.f32 %v657_v32, %v594_v30  ;;  %v669_v58 = vadd.f32 %v665_v33, %v598_v31 }
 0x2ba   :  { %2090 = vmatprep.subr.bf16.mxu0 %v2585_v15  ;;  %v659_v1 = vadd.f32 %v655_v44, %v592_v34 }
 0x2bb   :  { %v675_v6 = vadd.f32 %v671_v48, %v596_v50 }
 0x2bc   :  { %2109 = vmatpush3.bf16.msra.mxu1 %v679_v16 }
 0x2bd   :  { %2114 = vmatprep.subr.bf16.mxu1 %v2529_v54 }
 0x2bf   :  { %2111 = vmatmul.mubr.msk.bf16.vlgmr.msra.gmra.mrb[20].mxu1 %vm192_vm1, %v2491_v29  ;;  %v2258_v29 = vld [vmem:[%s2885_s15] sm:$0xff]  }
 0x2c0   :  { %2087 = vmatmul.mubr.msk.bf16.vlgmr.msra.gmra.mrb[0].mxu0 %vm192_vm1, %v441_v2  ;;  %2115 = vmatpush3.bf16.msra.mxu1 %v2529_v54  ;;  %v2350_v54 = vmov 0.0   ;;  %v667_v2 = vadd.f32 %v663_v51, %v596_v50 }
 0x2c1   :  { %2094 = vmatprep.mubr.msk.bf16.mxu0 %vm192_vm1, %v518_v3  ;;  %2091 = vmatpush3.bf16.msra.mxu0 %v2585_v15 }
 0x2c2   :  { %2092 = vmatprep.subr.bf16.mxu0 %v2594_v17  ;;  %2116 = vmatprep.subr.bf16.mxu1 %v2536_v55 }
 0x2c4   :  { %2117 = vmatpush3.bf16.msra.mxu1 %v2536_v55  ;;  %v2617_v55 = vld [vmem:[%s2877_s7] sm:$0xff]  }
 0x2c5   :  { %2093 = vmatpush3.bf16.msra.mxu0 %v2594_v17  ;;  %2122 = vmatprep.subr.bf16.mxu1 %v2543_v56 }
 0x2c6   :  { %2138 = vmatprep.subr.bf16.mxu0 %v2350_v54 }
 0x2cc   :  { %2095 = vmatmul.mubr.msk.bf16.vlgmr.msra.gmra.mrb[0].mxu0 %vm192_vm1, %v519_v42  ;;  %v677_v42 = vadd.f32 %v673_v40, %v598_v31 }
 0x2cd   :  { %2142 = vmatprep.mubr.msk.bf16.mxu0 %vm2351_vm2, %v2350_v54  ;;  %2139 = vmatpush3.bf16.msra.mxu0 %v2258_v29 }
 0x2ce   :  { %2140 = vmatprep.subr.bf16.mxu0 %v2350_v54 }
 0x2d1   :  { %2141 = vmatpush3.bf16.msra.mxu0 %v2259_v18 }
 0x2d2   :  { %2146 = vmatprep.subr.bf16.mxu0 %v2617_v55 }
 0x392   :  { %v2112_v46 = vpop.f32.mrb[20].mxu1 }
 0x393   :  { %v731_v39 = vsub.f32 %v652_v12, %v2112_v46  ;;  %v714_v43 = vpop.f32.mrb[21].mxu1 }
 0x394   :  { %v729_v49 = vsub.f32 %v2566_v9, %v714_v43  ;;  %v2113_v52 = vpop.f32.mrb[22].mxu1 }
 0x395   :  { %v735_v53 = vmul.f32 0.75, %v731_v39  ;;  %v732_v41 = vsub.f32 %v2569_v10, %v2113_v52  ;;  %v717_v59 = vpop.f32.mrb[23].mxu1  ;;  %v743_v60 = vmul.f32 -1.5, %v731_v39 }
 0x396   :  { %v733_v61 = vmul.f32 0.75, %v729_v49  ;;  %v741_v62 = vmul.f32 -1.5, %v729_v49  ;;  %v730_v63 = vsub.f32 %v2572_v11, %v717_v59  ;;  %v2262_v59 = vld [vmem:[%s2879_s9] sm:$0xff]  }
 0x397   :  { %v736_v0 = vmul.f32 0.75, %v732_v41  ;;  %v739_v3 = vadd.f32 %v735_v53, %v660_v35  ;;  %v751_v4 = vadd.f32 %v735_v53, %v676_v37  ;;  %v744_v5 = vmul.f32 -1.5, %v732_v41 }
 0x398   :  { %v734_v12 = vmul.f32 0.75, %v730_v63  ;;  %v742_v14 = vmul.f32 -1.5, %v730_v63  ;;  %v747_v16 = vadd.f32 %v743_v60, %v668_v36  ;;  %v737_v10 = vadd.f32 %v733_v61, %v658_v38 }
 0x399   :  { %v740_v7 = vadd.f32 %v736_v0, %v661_v57  ;;  %v752_v9 = vadd.f32 %v736_v0, %v677_v42  ;;  %v745_v29 = vadd.f32 %v741_v62, %v666_v45  ;;  %v748_v54 = vadd.f32 %v744_v5, %v669_v58 }
 0x39a   :  { %v738_v20 = vadd.f32 %v734_v12, %v659_v1  ;;  %v746_v11 = vadd.f32 %v742_v14, %v667_v2  ;;  %v749_v21 = vadd.f32 %v733_v61, %v674_v47  ;;  %v750_v23 = vadd.f32 %v734_v12, %v675_v6 }
 0x39b   :  { %v754_v18 = vpack.c.bf16 %v740_v7, %v739_v3  ;;  %v876_v19 = vpack.c.bf16 %v752_v9, %v751_v4  ;;  %v815_v22 = vpack.c.bf16 %v748_v54, %v747_v16  ;;  %v1017_v42 = vlaneseq }
 0x39c   :  { %v753_v24 = vpack.c.bf16 %v738_v20, %v737_v10  ;;  %v814_v26 = vpack.c.bf16 %v746_v11, %v745_v29  ;;  %v875_v27 = vpack.c.bf16 %v750_v23, %v749_v21  ;;  %v1940_v21 = vld [vmem:[%s2878_s8] ss:$0 sm:$0xff] }
 0x39e   :  { %2118 = vmatprep.mubr.msk.bf16.mxu1 %vm192_vm1, %v753_v24 }
 0x39f   :  { %v2096_v25 = vpop.f32.mrb[0].mxu0  ;;  %2119 = vmatmul.mubr.msk.bf16.vlgmr.msra.gmra.mrb[24].mxu1 %vm192_vm1, %v754_v18 }
 0x3a0   :  { %v572_v30 = vpop.f32.mrb[1].mxu0  ;;  %2126 = vmatprep.mubr.msk.bf16.mxu1 %vm192_vm1, %v814_v26  ;;  %2123 = vmatpush3.bf16.msra.mxu1 %v2543_v56  ;;  %v2202_v34 = vadd.f32 %v2096_v25, %v2643_v28 }
 0x3a1   :  { %v2648_v31 = vadd.f32 %v2643_v28, %v572_v30  ;;  %v2097_v32 = vpop.f32.mrb[2].mxu0  ;;  %2124 = vmatprep.subr.bf16.mxu1 %v2563_v8 }
 0x3a2   :  { %v575_v33 = vpop.f32.mrb[3].mxu0  ;;  %v2660_v36 = vadd.f32 %v2097_v32, %v2643_v28  ;;  %v939_v46 = vsel %vm192_vm1, %v2202_v34, 0.0 }
 0x3a3   :  { %v2655_v50 = vadd.f32 %v2643_v28, %v575_v33  ;;  %v936_v35 = vsel %vm192_vm1, %v2648_v31, 0.0 }
 0x3a4   :  { %2125 = vmatpush3.bf16.msra.mxu1 %v2563_v8  ;;  %v941_v39 = vsel %vm192_vm1, %v2660_v36, 0.0  ;;  %v1171_v41 = vpack.c.bf16 %v2660_v36, %v2202_v34 }
 0x3a5   :  { %v937_v37 = vsel %vm192_vm1, %v2655_v50, 0.0  ;;  %2130 = vmatprep.subr.bf16.mxu1 %v2585_v15 }
 0x3a6   :  { %v938_v56 = vadd.f32 %v937_v37, %v936_v35 }
 0x3a8   :  { %v940_v38 = vadd.f32 %v939_v46, %v938_v56 }
 0x3aa   :  { %v942_v43 = vadd.f32 %v941_v39, %v940_v38 }
 0x3ab   :  { %2127 = vmatmul.mubr.msk.bf16.vlgmr.msra.gmra.mrb[24].mxu1 %vm192_vm1, %v815_v22 }
 0x3ac   :  { %v943_v40 = vrot.slane %v942_v43, 4  ;;  %2134 = vmatprep.mubr.msk.bf16.mxu1 %vm192_vm1, %v875_v27  ;;  %2131 = vmatpush3.bf16.msra.mxu1 %v2585_v15  ;;  %v2261_v15 = vld [vmem:[%s2877_s7 + $0x8] sm:$0xff]  }
 0x3ad   :  { %2132 = vmatprep.subr.bf16.mxu1 %v2594_v17 }
 0x3ae   :  { %v944_v44 = vadd.f32 %v943_v40, %v942_v43 }
 0x3b0   :  { %v945_v8 = vrot.slane %v944_v44, 2  ;;  %2133 = vmatpush3.bf16.msra.mxu1 %v2594_v17  ;;  %v1170_v17 = vpack.c.bf16 %v2655_v50, %v2648_v31 }
 0x3b2   :  { %v946_v51 = vadd.f32 %v945_v8, %v944_v44 }
 0x3b4   :  { %v947_v45 = vrot.slane %v946_v51, 1 }
 0x3b6   :  { %v948_v47 = vadd.f32 %v947_v45, %v946_v51 }
 0x3b7   :  { %2135 = vmatmul.mubr.msk.bf16.vlgmr.msra.gmra.mrb[24].mxu1 %vm192_vm1, %v876_v19 }
 0x3b8   :  { %v1936_v49 = vmul.f32 -0.03125, %v948_v47 }
 0x3ba   :  { %v952_v52 = vmul.f32 1.442695, %v1936_v49 }
 0x3bc   :  { %2268 = vpow2.f32 %v952_v52  ;;  %v1260_v52 = vld [vmem:[%s2872_s2 + $0x10] sm:$0xff] }
 0x3c6   :  { %v2269_v48 = vpop.eup %2268 }
 0x3c7   :  { %v954_v53 = vadd.f32 1.0, %v2269_v48 }
 0x3c9   :  { %2270 = vrcp.f32 %v954_v53 }
 0x3d3   :  { %v2271_v57 = vpop.eup %2270 }
 0x3d4   :  { %v961_v58 = vpack.c.bf16 %v2271_v57, %v2271_v57 }
 0x3d6   :  { %2143 = vmatmul.mubr.msk.bf16.vlgmr.msra.gmra.mrb[4].mxu0 %vm192_vm1, %v961_v58 }
 0x3d7   :  { %2147 = vmatpush3.bf16.msra.mxu0 %v2617_v55  ;;  %2150 = vmatprep.mubr.msk.bf16.mxu0 %vm192_vm1, %v1170_v17  ;;  %v1018_v55 = vshrl.u32 %v1017_v42, 7  ;;  %v1258_v17 = vld [vmem:[%s2872_s2] sm:$0xff] }
 0x3d8   :  { %2148 = vmatprep.subr.bf16.mxu0 %v2261_v15 }
 0x3d9   :  { %v1019_v0 = vsub.s32 0, %v1018_v55  ;;  %v1259_v55 = vld [vmem:[%s2872_s2 + $0x8] sm:$0xff] }
 0x3db   :  { %2149 = vmatpush3.bf16.msra.mxu0 %v2261_v15  ;;  %v1261_v15 = vld [vmem:[%s2872_s2 + $0x18] sm:$0xff] }
 0x3dc   :  { %2154 = vmatprep.subr.bf16.mxu0 %v2262_v59 }
 0x3de   :  { %2151 = vmatmul.mubr.msk.bf16.vlgmr.msra.gmra.mrb[8].mxu0 %vm192_vm1, %v1171_v41 }
 0x3df   :  { %2155 = vmatpush3.bf16.msra.mxu0 %v2262_v59 }
 0x48a   :  { %v2136_v60 = vpop.f32.mrb[24].mxu1 }
 0x48b   :  { %v917_v61 = vpop.f32.mrb[25].mxu1  ;;  %v2206_v5 = vadd.f32 %v2136_v60, %v2643_v28 }
 0x48c   :  { %v2137_v62 = vpop.f32.mrb[26].mxu1  ;;  %v2207_v2 = vadd.f32 %v2643_v28, %v917_v61 }
 0x48d   :  { %v920_v63 = vpop.f32.mrb[27].mxu1  ;;  %v2208_v6 = vadd.f32 %v2137_v62, %v2643_v28 }
 0x48e   :  { %v2209_v7 = vadd.f32 %v2643_v28, %v920_v63 }
 0x4a9   :  { %v1011_v1 = vpop.f32.mrb[4].mxu0 }
 0x4aa   :  { %v1020_v3 = vrot.slane %v1011_v1, %v1019_v0  ;;  %v2144_v4 = vpop.f32.mrb[5].mxu0 }
 0x4ab   :  { %v1014_v9 = vpop.f32.mrb[6].mxu0 }
 0x4ac   :  { %v2145_v12 = vpop.f32.mrb[7].mxu0  ;;  %v1023_v14 = vmul.f32 %v2202_v34, %v1020_v3  ;;  %v1021_v16 = vmul.f32 %v2648_v31, %v1020_v3  ;;  %v1037_v10 = vmul.f32 %v2207_v2, %v1020_v3  ;;  %v1038_v29 = vmul.f32 %v2209_v7, %v1020_v3 }
 0x4ad   :  { %v1040_v54 = vmul.f32 %v2208_v6, %v1020_v3  ;;  %v1039_v18 = vmul.f32 %v2206_v5, %v1020_v3  ;;  %v1022_v11 = vmul.f32 %v2655_v50, %v1020_v3  ;;  %v1024_v23 = vmul.f32 %v2660_v36, %v1020_v3 }
 0x4ae   :  { %v1031_v19 = vsel %vm192_vm1, %v1023_v14, 0.0  ;;  %v1025_v20 = vsel %vm192_vm1, %v1021_v16, 0.0  ;;  %v1041_v27 = vsel %vm192_vm1, %v1037_v10, 0.0  ;;  %v1044_v38 = vsel %vm192_vm1, %v1038_v29, 0.0 }
 0x4af   :  { %1032 = vadd.xlane.f32.xlu1 %v1031_v19  ;;  %1026 = vadd.xlane.f32.xlu0 %v1025_v20  ;;  %v1028_v28 = vsel %vm192_vm1, %v1022_v11, 0.0  ;;  %v1034_v37 = vsel %vm192_vm1, %v1024_v23, 0.0  ;;  %v1050_v45 = vsel %vm192_vm1, %v1040_v54, 0.0  ;;  %v1047_v47 = vsel %vm192_vm1, %v1039_v18, 0.0 }
 0x4b1   :  { %v2152_v22 = vpop.f32.mrb[8].mxu0 }
 0x4b2   :  { %v2700_v24 = vadd.f32 %v2152_v22, %v1940_v21  ;;  %v1231_v26 = vpop.f32.mrb[9].mxu0 }
 0x4b3   :  { %v2704_v25 = vadd.f32 %v1940_v21, %v1231_v26  ;;  %1042 = vadd.xlane.f32.xlu1 %v1041_v27  ;;  %1029 = vadd.xlane.f32.xlu0 %v1028_v28  ;;  %v2153_v30 = vpop.f32.mrb[10].mxu0 }
 0x4b4   :  { %v1248_v31 = vmul.f32 0.5, %v2700_v24  ;;  %v1845_v32 = vmul.f32 1.442695, %v2700_v24  ;;  %v1243_v33 = vadd.f32 %v2153_v30, %v1940_v21  ;;  %v1234_v34 = vpop.f32.mrb[11].mxu0  ;;  %v1831_v59 = vadd.f32 1.0, %v2700_v24 }
 0x4b5   :  { %v1246_v50 = vmul.f32 0.5, %v2704_v25  ;;  %v1841_v35 = vmul.f32 1.442695, %v2704_v25  ;;  %v1235_v36 = vadd.f32 %v1940_v21, %v1234_v34  ;;  %v1829_v48 = vadd.f32 1.0, %v2704_v25 }
 0x4b6   :  { %v1254_v56 = vmul.f32 1.442695, %v1248_v31  ;;  %2272 = vpow2.f32 %v1845_v32  ;;  %v1249_v46 = vmul.f32 0.5, %v1243_v33  ;;  %v1847_v43 = vmul.f32 1.442695, %v1243_v33 }
 0x4b7   :  { %v1250_v39 = vmul.f32 1.442695, %v1246_v50  ;;  %2274 = vpow2.f32 %v1841_v35  ;;  %v1247_v40 = vmul.f32 0.5, %v1235_v36  ;;  %1035 = vadd.xlane.f32.xlu1 %v1034_v37  ;;  %1045 = vadd.xlane.f32.xlu0 %v1044_v38  ;;  %v1843_v51 = vmul.f32 1.442695, %v1235_v36 }
 0x4b8   :  { %2276 = vpow2.f32 %v1254_v56  ;;  %v1256_v44 = vmul.f32 1.442695, %v1249_v46  ;;  %v1833_v53 = vmul.f32 %v2704_v25, %v2704_v25  ;;  %v1830_v41 = vadd.f32 1.0, %v1235_v36 }
 0x4b9   :  { %2278 = vpow2.f32 %v1250_v39  ;;  %v1252_v8 = vmul.f32 1.442695, %v1247_v40  ;;  %v1834_v60 = vmul.f32 %v1235_v36, %v1235_v36  ;;  %v1835_v61 = vmul.f32 %v2700_v24, %v2700_v24 }
 0x4ba   :  { %2280 = vpow2.f32 %v1256_v44  ;;  %v1832_v0 = vadd.f32 1.0, %v1243_v33  ;;  %v1836_v1 = vmul.f32 %v1243_v33, %v1243_v33  ;;  %v1837_v2 = vsub.f32 %v1829_v48, %v1833_v53 }
 0x4bb   :  { %2282 = vpow2.f32 %v1847_v43  ;;  %1051 = vadd.xlane.f32.xlu1 %v1050_v45  ;;  %1048 = vadd.xlane.f32.xlu0 %v1047_v47  ;;  %v1838_v7 = vsub.f32 %v1830_v41, %v1834_v60  ;;  %v1839_v9 = vsub.f32 %v1831_v59, %v1835_v61 }
 0x4bc   :  { %2284 = vpow2.f32 %v1252_v8  ;;  %v1840_v54 = vsub.f32 %v1832_v0, %v1836_v1 }
 0x4bd   :  { %2286 = vpow2.f32 %v1843_v51 }
 0x4c0   :  { %v2273_v49 = vpop.eup %2272 }
 0x4c1   :  { %v2275_v57 = vpop.eup %2274  ;;  %v1851_v19 = vsub.f32 %v1839_v9, %v2273_v49 }
 0x4c2   :  { %v2277_v58 = vpop.eup %2276  ;;  %v1849_v12 = vsub.f32 %v1837_v2, %v2275_v57 }
 0x4c3   :  { %v2279_v62 = vpop.eup %2278  ;;  %v1264_v63 = vmul.f32 %v2277_v58, %v1260_v52  ;;  %v1856_v30 = vsel %vm86_vm0, %v1851_v19, 0.0 }
 0x4c4   :  { %v2281_v42 = vpop.eup %2280  ;;  %v1262_v5 = vmul.f32 %v2279_v62, %v1258_v17  ;;  %v1853_v23 = vsel %vm86_vm0, %v1849_v12, 0.0 }
 0x4c5   :  { %v2283_v3 = vpop.eup %2282  ;;  %v1265_v4 = vmul.f32 %v2281_v42, %v1261_v15  ;;  %v1268_v16 = vadd.f32 %v1264_v63, %v2700_v24 }
 0x4c6   :  { %v2285_v6 = vpop.eup %2284  ;;  %v1266_v20 = vadd.f32 %v1262_v5, %v2704_v25  ;;  %v1852_v22 = vsub.f32 %v1840_v54, %v2283_v3  ;;  %v2263_v25 = vld [vmem:[%s2881_s11] sm:$0xff]  }
 0x4c7   :  { %v2287_v14 = vpop.eup %2286  ;;  %v1269_v10 = vadd.f32 %v1265_v4, %v1243_v33  ;;  %v1263_v29 = vmul.f32 %v2285_v6, %v1259_v55  ;;  %2160 = vmatprep.subr.bf16.mxu1 %v2263_v25  ;;  %v2264_v33 = vld [vmem:[%s2881_s11 + $0x8] sm:$0xff]   ;;  %s2326_s11 = scalar_lea.vmem %s1886_s28, 16 }
 0x4c8   :  { %v1850_v18 = vsub.f32 %v1838_v7, %v2287_v14  ;;  %v1858_v31 = vsel %vm86_vm0, %v1852_v22, 0.0  ;;  %2161 = vmatpush3.bf16.msra.mxu1 %v2263_v25  ;;  %p2327_p0 = scmp.ne.s32.totalorder %s1886_s28, %s2326_s11  ;;  %p2332_p2 = scmp.lt.s32.totalorder %s2330_s4, %s2326_s11 }
 0x4c9   :  { %v1267_v11 = vadd.f32 %v1263_v29, %v1235_v36  ;;  %v1273_v21 = vpack.c.bf16 %v1269_v10, %v1268_v16  ;;  %2162 = vmatprep.subr.bf16.mxu1 %v2264_v33 }
 0x4ca   :  { %v1854_v26 = vsel %vm86_vm0, %v1850_v18, 0.0  ;;  %p2333_p3 = por %p2332_p2, %p2331_p1 }
 0x4cb   :  { %v1272_v27 = vpack.c.bf16 %v1267_v11, %v1266_v20  ;;  %v1855_v28 = vadd.f32 %v1854_v26, %v1853_v23 }
 0x4cc   :  { %2163 = vmatpush3.bf16.msra.mxu1 %v2264_v33  ;;  %p2334_p4 = pnand %p2333_p3, %p2327_p0 }
 0x4cd   :  { %2156 = vmatprep.mubr.msk.bf16.mxu0 %vm86_vm0, %v1272_v27  ;;  %v1857_v24 = vadd.f32 %v1856_v30, %v1855_v28 }
 0x4ce   :  { %2157 = vmatmul.mubr.msk.bf16.vlgmr.msra.gmra.mrb[12].mxu0 %vm86_vm0, %v1273_v21 }
 0x4cf   :  { %v2740_v32 = vadd.f32 %v1858_v31, %v1857_v24  ;;  %2172 = vmatprep.mubr.msk.bf16.mxu0 %vm192_vm1, %v2472_v13 }
 0x53c   :  { %v2750_v34 = vpop.xlane.xlu1 %1032  ;;  %v2752_v50 = vpop.xlane.xlu0 %1026 }
 0x53d   :  { %v1055_v35 = vsub.f32 0.0, %v2750_v34  ;;  %v1053_v13 = vsub.f32 0.0, %v2752_v50 }
 0x53f   :  { %v1063_v36 = vand.u32 2147483647, %v1055_v35  ;;  %v1061_v37 = vand.u32 2147483647, %v1053_v13  ;;  %v1057_v28 = vmax.f32 %v1053_v13, 0.0  ;;  %v1059_v24 = vmax.f32 %v1055_v35, 0.0 }
 0x540   :  { %v2760_v56 = vpop.xlane.xlu1 %1042  ;;  %v2762_v46 = vpop.xlane.xlu0 %1029 }
 0x541   :  { %v1067_v38 = vsub.f32 0.0, %v1063_v36  ;;  %v1065_v39 = vsub.f32 0.0, %v1061_v37  ;;  %v1115_v43 = vand.u32 2147483647, %v2760_v56  ;;  %v1054_v40 = vsub.f32 0.0, %v2762_v46 }
 0x543   :  { %v1073_v44 = vmul.f32 1.442695, %v1067_v38  ;;  %v1069_v8 = vmul.f32 1.442695, %v1065_v39  ;;  %v1119_v51 = vsub.f32 0.0, %v1115_v43  ;;  %v1058_v33 = vmax.f32 %v1054_v40, 0.0 }
 0x544   :  { %v1062_v45 = vand.u32 2147483647, %v1054_v40  ;;  %v2768_v47 = vpop.xlane.xlu1 %1035  ;;  %v2770_v49 = vpop.xlane.xlu0 %1045  ;;  %v1111_v38 = vmax.f32 %v2760_v56, 0.0 }
 0x545   :  { %2288 = vpow2.f32 %v1073_v44  ;;  %v1123_v52 = vmul.f32 1.442695, %v1119_v51  ;;  %v1056_v48 = vsub.f32 0.0, %v2768_v47  ;;  %v1116_v57 = vand.u32 2147483647, %v2770_v49 }
 0x546   :  { %2290 = vpow2.f32 %v1069_v8  ;;  %v1066_v53 = vsub.f32 0.0, %v1062_v45  ;;  %v1112_v50 = vmax.f32 %v2770_v49, 0.0 }
 0x547   :  { %2292 = vpow2.f32 %v1123_v52  ;;  %v1064_v58 = vand.u32 2147483647, %v1056_v48  ;;  %v1120_v17 = vsub.f32 0.0, %v1116_v57  ;;  %v1060_v34 = vmax.f32 %v1056_v48, 0.0 }
 0x548   :  { %v1071_v15 = vmul.f32 1.442695, %v1066_v53  ;;  %v2776_v41 = vpop.xlane.xlu1 %1051  ;;  %v2778_v59 = vpop.xlane.xlu0 %1048 }
 0x549   :  { %v1068_v60 = vsub.f32 0.0, %v1064_v58  ;;  %v1118_v61 = vand.u32 2147483647, %v2776_v41  ;;  %v1125_v62 = vmul.f32 1.442695, %v1120_v17  ;;  %v1114_v56 = vmax.f32 %v2776_v41, 0.0 }
 0x54a   :  { %2294 = vpow2.f32 %v1071_v15  ;;  %v1117_v63 = vand.u32 2147483647, %v2778_v59  ;;  %v1113_v15 = vmax.f32 %v2778_v59, 0.0 }
 0x54b   :  { %v1075_v42 = vmul.f32 1.442695, %v1068_v60  ;;  %v1122_v55 = vsub.f32 0.0, %v1118_v61  ;;  %2296 = vpow2.f32 %v1125_v62 }
 0x54c   :  { %v1121_v0 = vsub.f32 0.0, %v1117_v63 }
 0x54d   :  { %2298 = vpow2.f32 %v1075_v42  ;;  %v1129_v1 = vmul.f32 1.442695, %v1122_v55 }
 0x54e   :  { %v1127_v2 = vmul.f32 1.442695, %v1121_v0 }
 0x54f   :  { %v2289_v3 = vpop.eup %2288  ;;  %2300 = vpow2.f32 %v1129_v1 }
 0x550   :  { %v2291_v4 = vpop.eup %2290  ;;  %v1079_v5 = vadd.f32 1.0, %v2289_v3  ;;  %2302 = vpow2.f32 %v1127_v2  ;;  %v1945_v3 = vld [vmem:[%s2880_s10] ss:$0 sm:$0xff] }
 0x551   :  { %v2293_v6 = vpop.eup %2292  ;;  %v1077_v7 = vadd.f32 1.0, %v2291_v4 }
 0x552   :  { %2304 = vlog2.f32 %v1079_v5  ;;  %v1131_v9 = vadd.f32 1.0, %v2293_v6 }
 0x553   :  { %2306 = vlog2.f32 %v1077_v7 }
 0x554   :  { %v2295_v12 = vpop.eup %2294  ;;  %2308 = vlog2.f32 %v1131_v9 }
 0x555   :  { %v1078_v14 = vadd.f32 1.0, %v2295_v12  ;;  %v2297_v16 = vpop.eup %2296 }
 0x556   :  { %v1132_v29 = vadd.f32 1.0, %v2297_v16 }
 0x557   :  { %v2299_v10 = vpop.eup %2298  ;;  %2310 = vlog2.f32 %v1078_v14 }
 0x558   :  { %v1080_v54 = vadd.f32 1.0, %v2299_v10  ;;  %2312 = vlog2.f32 %v1132_v29 }
 0x559   :  { %v2301_v18 = vpop.eup %2300 }
 0x55a   :  { %v2303_v19 = vpop.eup %2302  ;;  %2314 = vlog2.f32 %v1080_v54  ;;  %v1134_v20 = vadd.f32 1.0, %v2301_v18 }
 0x55b   :  { %v1133_v11 = vadd.f32 1.0, %v2303_v19 }
 0x55c   :  { %v2305_v21 = vpop.eup %2304  ;;  %2316 = vlog2.f32 %v1134_v20 }
 0x55d   :  { %v2307_v22 = vpop.eup %2306  ;;  %2318 = vlog2.f32 %v1133_v11  ;;  %v1086_v27 = vmul.f32 0.6931472, %v2305_v21 }
 0x55e   :  { %v1082_v23 = vmul.f32 0.6931472, %v2307_v22  ;;  %v2309_v26 = vpop.eup %2308 }
 0x55f   :  { %v1136_v25 = vmul.f32 0.6931472, %v2309_v26  ;;  %v1091_v43 = vadd.f32 %v1086_v27, %v1059_v24 }
 0x560   :  { %v1089_v31 = vadd.f32 %v1082_v23, %v1057_v28 }
 0x561   :  { %v2311_v30 = vpop.eup %2310  ;;  %v1143_v51 = vadd.f32 %v1136_v25, %v1111_v38  ;;  %v1097_v48 = vsel %vm1093_vm3, %v1091_v43, 0.0 }
 0x562   :  { %v1084_v36 = vmul.f32 0.6931472, %v2311_v30  ;;  %v2313_v37 = vpop.eup %2312  ;;  %v1094_v46 = vsel %vm1093_vm3, %v1089_v31, 0.0  ;;  %v1949_v31 = vld [vmem:[%s2882_s12] ss:$0 sm:$0xff] }
 0x563   :  { %v1138_v13 = vmul.f32 0.6931472, %v2313_v37  ;;  %v1147_v61 = vsel %vm1093_vm3, %v1143_v51, 0.0 }
 0x564   :  { %v2315_v39 = vpop.eup %2314  ;;  %v1090_v44 = vadd.f32 %v1084_v36, %v1058_v33 }
 0x565   :  { %v1088_v35 = vmul.f32 0.6931472, %v2315_v39  ;;  %v1144_v45 = vadd.f32 %v1138_v13, %v1112_v50 }
 0x566   :  { %v2317_v8 = vpop.eup %2316  ;;  %v1095_v40 = vsel %vm1093_vm3, %v1090_v44, 0.0 }
 0x567   :  { %v2319_v52 = vpop.eup %2318  ;;  %v1142_v53 = vmul.f32 0.6931472, %v2317_v8  ;;  %v1092_v57 = vadd.f32 %v1088_v35, %v1060_v34  ;;  %v1096_v58 = vadd.f32 %v1095_v40, %v1094_v46  ;;  %v1148_v49 = vsel %vm1093_vm3, %v1144_v45, 0.0  ;;  %v2321_v45 = vld [vmem:[%s2871_s1 + $0x8] sm:$0xff]  }
 0x568   :  { %v1140_v47 = vmul.f32 0.6931472, %v2319_v52  ;;  %v1149_v55 = vadd.f32 %v1148_v49, %v1147_v61 }
 0x569   :  { %v1098_v17 = vadd.f32 %v1097_v48, %v1096_v58  ;;  %v1099_v60 = vsel %vm1093_vm3, %v1092_v57, 0.0  ;;  %v1146_v62 = vadd.f32 %v1142_v53, %v1114_v56  ;;  %v2265_v48 = vld [vmem:[%s2883_s13] sm:$0xff]  }
 0x56a   :  { %v1145_v63 = vadd.f32 %v1140_v47, %v1113_v15 }
 0x56b   :  { %v1100_v42 = vadd.f32 %v1099_v60, %v1098_v17  ;;  %v1152_v1 = vsel %vm1093_vm3, %v1146_v62, 0.0  ;;  %v2826_v17 = vld [vmem:[%s2883_s13 + $0x8] sm:$0xff]  }
 0x56c   :  { %v1150_v41 = vsel %vm1093_vm3, %v1145_v63, 0.0 }
 0x56d   :  { %1101 = vadd.xlane.f32.xlu0 %v1100_v42  ;;  %v1151_v0 = vadd.f32 %v1150_v41, %v1149_v55 }
 0x56f   :  { %v1153_v2 = vadd.f32 %v1152_v1, %v1151_v0 }
 0x571   :  { %1154 = vadd.xlane.f32.xlu1 %v1153_v2 }
 0x575   :  { %1860 = vadd.xlane.f32.xlu1 %v2740_v32  ;;  %v2320_v32 = vld [vmem:[%s2871_s1] sm:$0xff]  }
 0x5a1   :  { %v2158_v59 = vpop.f32.mrb[12].mxu0 }
 0x5a2   :  { %v1327_v4 = vpop.f32.mrb[13].mxu0  ;;  %v1336_v6 = vadd.f32 %v2158_v59, %v1945_v3 }
 0x5a3   :  { %v2159_v5 = vpop.f32.mrb[14].mxu0  ;;  %v1328_v12 = vadd.f32 %v1945_v3, %v1327_v4 }
 0x5a4   :  { %v1339_v7 = vadd.f32 %v2159_v5, %v1945_v3  ;;  %v1330_v9 = vpop.f32.mrb[15].mxu0 }
 0x5a5   :  { %v1331_v14 = vadd.f32 %v1945_v3, %v1330_v9 }
 0x5a6   :  { %v1347_v16 = vpack.c.bf16 %v1339_v7, %v1336_v6 }
 0x5a7   :  { %v1346_v10 = vpack.c.bf16 %v1331_v14, %v1328_v12 }
 0x5a9   :  { %2164 = vmatprep.mubr.msk.bf16.mxu1 %vm192_vm1, %v1346_v10 }
 0x5aa   :  { %2165 = vmatmul.mubr.msk.bf16.vlgmr.msra.gmra.mrb[28].mxu1 %vm192_vm1, %v1347_v16 }
 0x5ab   :  { %2180 = vmatprep.mubr.msk.bf16.mxu1 %vm192_vm1, %v2320_v32 }
 0x5fa   :  { %v1102_v29 = vpop.xlane.xlu0 %1101 }
 0x5fb   :  { %v1103_v54 = vrot.slane %v1102_v29, 4 }
 0x5fd   :  { %v1104_v18 = vadd.f32 %v1103_v54, %v1102_v29 }
 0x5fe   :  { %v1155_v19 = vpop.xlane.xlu1 %1154 }
 0x5ff   :  { %v1105_v20 = vrot.slane %v1104_v18, 2  ;;  %v1156_v11 = vrot.slane %v1155_v19, 4 }
 0x601   :  { %v1157_v21 = vadd.f32 %v1156_v11, %v1155_v19  ;;  %v1106_v22 = vadd.f32 %v1105_v20, %v1104_v18 }
 0x603   :  { %v1158_v23 = vrot.slane %v1157_v21, 2  ;;  %v1107_v26 = vrot.slane %v1106_v22, 1 }
 0x605   :  { %v1108_v27 = vadd.f32 %v1107_v26, %v1106_v22  ;;  %v1159_v28 = vadd.f32 %v1158_v23, %v1157_v21 }
 0x607   :  { %2238 = vpush %v1108_v27  ;;  %v1160_v30 = vrot.slane %v1159_v28, 1 }
 0x609   :  { %v1161_v24 = vadd.f32 %v1160_v30, %v1159_v28 }
 0x60b   :  { %2240 = vpush %v1161_v24 }
 0x67d   :  { %v2166_v25 = vpop.f32.mrb[28].mxu1 }
 0x67e   :  { %v1407_v33 = vpop.f32.mrb[29].mxu1  ;;  %v1416_v43 = vadd.f32 %v2166_v25, %v1949_v31 }
 0x67f   :  { %v1408_v36 = vadd.f32 %v1949_v31, %v1407_v33  ;;  %v2167_v37 = vpop.f32.mrb[30].mxu1 }
 0x680   :  { %v1419_v38 = vadd.f32 %v2167_v37, %v1949_v31  ;;  %v1410_v39 = vpop.f32.mrb[31].mxu1  ;;  %v1424_v35 = vmax.f32 %v1416_v43, 0.0 }
 0x681   :  { %v1411_v44 = vadd.f32 %v1949_v31, %v1410_v39  ;;  %v1422_v50 = vmax.f32 %v1408_v36, 0.0 }
 0x682   :  { %v1425_v13 = vmax.f32 %v1419_v38, 0.0  ;;  %v1428_v42 = vmul.f32 3.0, %v1424_v35  ;;  %v1432_v55 = vmul.f32 0.0, %v1424_v35 }
 0x683   :  { %v1423_v34 = vmax.f32 %v1411_v44, 0.0  ;;  %v1426_v41 = vmul.f32 3.0, %v1422_v50  ;;  %v1430_v0 = vmul.f32 0.0, %v1422_v50 }
 0x684   :  { %v1435_v51 = vpack.c.bf16 %v1425_v13, %v1424_v35  ;;  %v1429_v59 = vmul.f32 3.0, %v1425_v13  ;;  %v1433_v3 = vmul.f32 0.0, %v1425_v13 }
 0x685   :  { %v1434_v8 = vpack.c.bf16 %v1423_v34, %v1422_v50  ;;  %v1427_v6 = vmul.f32 3.0, %v1423_v34  ;;  %v1431_v7 = vmul.f32 0.0, %v1423_v34 }
 0x687   :  { %2168 = vmatprep.subr.bf16.mxu0 %v1434_v8 }
 0x688   :  { %2169 = vmatpush3.bf16.msra.mxu0 %v1434_v8 }
 0x689   :  { %2170 = vmatprep.subr.bf16.mxu0 %v1435_v51 }
 0x68c   :  { %2171 = vmatpush3.bf16.msra.mxu0 %v1435_v51 }
 0x68d   :  { %2184 = vmatprep.subr.bf16.mxu0 %v2265_v48 }
 0x68f   :  { %2173 = vmatmul.mubr.msk.bf16.vlgmr.msra.gmra.mrb[16].mxu0 %vm192_vm1, %v2321_v45 }
 0x690   :  { %2185 = vmatpush3.bf16.msra.mxu0 %v2265_v48 }
 0x691   :  { %2190 = vmatprep.subr.bf16.mxu0 %v2826_v17 }
 0x762   :  { %v2174_v46 = vpop.f32.mrb[16].mxu0 }
 0x763   :  { %v1470_v40 = vpop.f32.mrb[17].mxu0  ;;  %v1487_v49 = vsub.f32 %v1424_v35, %v2174_v46 }
 0x764   :  { %v2175_v52 = vpop.f32.mrb[18].mxu0  ;;  %v1485_v53 = vsub.f32 %v1422_v50, %v1470_v40 }
 0x765   :  { %v1473_v56 = vpop.f32.mrb[19].mxu0  ;;  %v1488_v57 = vsub.f32 %v1425_v13, %v2175_v52  ;;  %v1491_v60 = vmul.f32 -3.0, %v1487_v49  ;;  %v1499_v61 = vmul.f32 3.0, %v1487_v49  ;;  %v1507_v62 = vmul.f32 0.0, %v1487_v49 }
 0x766   :  { %v1486_v58 = vsub.f32 %v1423_v34, %v1473_v56  ;;  %v1489_v63 = vmul.f32 -3.0, %v1485_v53  ;;  %v1497_v1 = vmul.f32 3.0, %v1485_v53  ;;  %v1505_v2 = vmul.f32 0.0, %v1485_v53 }
 0x767   :  { %v1514_v47 = vpack.c.bf16 %v1488_v57, %v1487_v49  ;;  %v1492_v4 = vmul.f32 -3.0, %v1488_v57  ;;  %v1500_v5 = vmul.f32 3.0, %v1488_v57  ;;  %v1495_v9 = vadd.f32 %v1491_v60, %v1428_v42  ;;  %v1961_v42 = vld [vmem:[%s2884_s14] ss:$0 sm:$0xff] }
 0x768   :  { %v1513_v15 = vpack.c.bf16 %v1486_v58, %v1485_v53  ;;  %v1503_v12 = vadd.f32 %v1499_v61, %v1432_v55  ;;  %v1511_v14 = vadd.f32 %v1507_v62, %v1432_v55  ;;  %v1493_v10 = vadd.f32 %v1489_v63, %v1426_v41  ;;  %v2267_v63 = vld [vmem:[%s2883_s13 + $0x10] sm:$0xff]  }
 0x769   :  { %v1508_v54 = vmul.f32 0.0, %v1488_v57  ;;  %v1490_v18 = vmul.f32 -3.0, %v1486_v58  ;;  %v1498_v19 = vmul.f32 3.0, %v1486_v58  ;;  %v1501_v20 = vadd.f32 %v1497_v1, %v1430_v0 }
 0x76a   :  { %2176 = vmatprep.subr.bf16.mxu1 %v1513_v15  ;;  %v1509_v11 = vadd.f32 %v1505_v2, %v1430_v0  ;;  %v1506_v23 = vmul.f32 0.0, %v1486_v58  ;;  %v1496_v27 = vadd.f32 %v1492_v4, %v1429_v59  ;;  %v1504_v28 = vadd.f32 %v1500_v5, %v1433_v3  ;;  %v2323_v5 = vld [vmem:[%s2889_s25] sm:$0xff] }
 0x76b   :  { %2177 = vmatpush3.bf16.msra.mxu1 %v1513_v15  ;;  %v1512_v37 = vadd.f32 %v1508_v54, %v1433_v3  ;;  %v1494_v39 = vadd.f32 %v1490_v18, %v1427_v6  ;;  %v1502_v43 = vadd.f32 %v1498_v19, %v1431_v7 }
 0x76c   :  { %2178 = vmatprep.subr.bf16.mxu1 %v1514_v47  ;;  %v1510_v34 = vadd.f32 %v1506_v23, %v1431_v7 }
 0x76f   :  { %2179 = vmatpush3.bf16.msra.mxu1 %v1514_v47 }
 0x772   :  { %2181 = vmatmul.mubr.msk.bf16.vlgmr.msra.gmra.mrb[32].mxu1 %vm192_vm1, %v2321_v45 }
 0x845   :  { %v2182_v16 = vpop.f32.mrb[32].mxu1 }
 0x846   :  { %v1566_v32 = vsub.f32 %v1487_v49, %v2182_v16  ;;  %v1549_v29 = vpop.f32.mrb[33].mxu1  ;;  %v2325_v16 = vld [vmem:[%s2889_s25 + $0x8] sm:$0xff] }
 0x847   :  { %v1564_v21 = vsub.f32 %v1485_v53, %v1549_v29  ;;  %v2183_v22 = vpop.f32.mrb[34].mxu1 }
 0x848   :  { %v1570_v26 = vmul.f32 0.75, %v1566_v32  ;;  %v1567_v30 = vsub.f32 %v1488_v57, %v2183_v22  ;;  %v1552_v24 = vpop.f32.mrb[35].mxu1  ;;  %v1578_v31 = vmul.f32 -1.5, %v1566_v32 }
 0x849   :  { %v1568_v25 = vmul.f32 0.75, %v1564_v21  ;;  %v1576_v33 = vmul.f32 -1.5, %v1564_v21  ;;  %v1565_v36 = vsub.f32 %v1486_v58, %v1552_v24 }
 0x84a   :  { %v1571_v38 = vmul.f32 0.75, %v1567_v30  ;;  %v1574_v44 = vadd.f32 %v1570_v26, %v1495_v9  ;;  %v1586_v50 = vadd.f32 %v1570_v26, %v1511_v14  ;;  %v1579_v13 = vmul.f32 -1.5, %v1567_v30  ;;  %v1861_v26 = vpop.xlane.xlu1 %1860 }
 0x84b   :  { %v1569_v51 = vmul.f32 0.75, %v1565_v36  ;;  %v1577_v45 = vmul.f32 -1.5, %v1565_v36  ;;  %v1582_v46 = vadd.f32 %v1578_v31, %v1503_v12  ;;  %v1572_v40 = vadd.f32 %v1568_v25, %v1493_v10  ;;  %v2324_v12 = vld [vmem:[%s2889_s25 + $0x18] sm:$0xff] }
 0x84c   :  { %v1575_v35 = vadd.f32 %v1571_v38, %v1496_v27  ;;  %v1587_v8 = vadd.f32 %v1571_v38, %v1512_v37  ;;  %v1580_v52 = vadd.f32 %v1576_v33, %v1501_v20  ;;  %v1583_v56 = vadd.f32 %v1579_v13, %v1504_v28 }
 0x84d   :  { %v1573_v49 = vadd.f32 %v1569_v51, %v1494_v39  ;;  %v1581_v58 = vadd.f32 %v1577_v45, %v1502_v43  ;;  %v1584_v15 = vadd.f32 %v1568_v25, %v1509_v11  ;;  %v1585_v48 = vadd.f32 %v1569_v51, %v1510_v34 }
 0x84e   :  { %v1592_v53 = vpack.c.bf16 %v1575_v35, %v1574_v44  ;;  %v1738_v57 = vpack.c.bf16 %v1587_v8, %v1586_v50  ;;  %v1668_v47 = vpack.c.bf16 %v1583_v56, %v1582_v46  ;;  %v1862_v27 = vrot.slane %v1861_v26, 4 }
 0x84f   :  { %v1591_v60 = vpack.c.bf16 %v1573_v49, %v1572_v40  ;;  %v1667_v61 = vpack.c.bf16 %v1581_v58, %v1580_v52  ;;  %v1737_v62 = vpack.c.bf16 %v1585_v48, %v1584_v15 }
 0x850   :  { %v1863_v28 = vadd.f32 %v1862_v27, %v1861_v26 }
 0x851   :  { %2186 = vmatprep.mubr.msk.bf16.mxu0 %vm86_vm0, %v1591_v60 }
 0x852   :  { %2187 = vmatmul.mubr.msk.bf16.vlgmr.msra.gmra.mrb[20].mxu0 %vm86_vm0, %v1592_v53  ;;  %v1864_v30 = vrot.slane %v1863_v28, 2 }
 0x853   :  { %2192 = vmatprep.mubr.msk.bf16.mxu0 %vm86_vm0, %v1667_v61  ;;  %2191 = vmatpush3.bf16.msra.mxu0 %v2826_v17  ;;  %v2322_v17 = vld [vmem:[%s2889_s25 + $0x10] sm:$0xff]  ;;  %s2239_s25 = spop %2238 }
 0x854   :  { %2196 = vmatprep.subr.bf16.mxu0 %v2267_v63  ;;  %v1865_v33 = vadd.f32 %v1864_v30, %v1863_v28  ;;  %s2241_s26 = spop %2240  ;;  %v1110_v13 = vstv %s2239_s25 }
 0x855   :  { %v1163_v50 = vstv %s2241_s26 }
 0x856   :  { %v1866_v38 = vrot.slane %v1865_v33, 1  ;;  %v1164_v34 = vadd.f32 %v1163_v50, %v1110_v13 }
 0x858   :  { %v1867_v44 = vadd.f32 %v1866_v38, %v1865_v33  ;;  %v1165_v45 = vmul.f32 0.03125, %v1164_v34 }
 0x85a   :  { %v1875_v56 = vmul.f32 0.0, %v1165_v45 }
 0x85e   :  { %2193 = vmatmul.mubr.msk.bf16.vlgmr.msra.gmra.mrb[20].mxu0 %vm86_vm0, %v1668_v47 }
 0x85f   :  { %2198 = vmatprep.mubr.msk.bf16.mxu0 %vm86_vm0, %v1737_v62  ;;  %2197 = vmatpush3.bf16.msra.mxu0 %v2267_v63 }
 0x86a   :  { %2199 = vmatmul.mubr.msk.bf16.vlgmr.msra.gmra.mrb[20].mxu0 %vm86_vm0, %v1738_v57 }
 0x93d   :  { %v2200_v55 = vpop.f32.mrb[20].mxu0 }
 0x93e   :  { %v2210_v41 = vadd.f32 %v2200_v55, %v1961_v42  ;;  %v1785_v0 = vpop.f32.mrb[21].mxu0 }
 0x93f   :  { %v2211_v1 = vadd.f32 %v1961_v42, %v1785_v0  ;;  %v2201_v2 = vpop.f32.mrb[22].mxu0 }
 0x940   :  { %v2212_v59 = vadd.f32 %v2201_v2, %v1961_v42  ;;  %v1788_v3 = vpop.f32.mrb[23].mxu0  ;;  %v1806_v4 = vsub.f32 %v2210_v41, %v2322_v17 }
 0x941   :  { %v1804_v6 = vsub.f32 %v2211_v1, %v2323_v5  ;;  %v2213_v7 = vadd.f32 %v1961_v42, %v1788_v3 }
 0x942   :  { %v1807_v14 = vsub.f32 %v2212_v59, %v2324_v12  ;;  %v1810_v32 = vmul.f32 %v1806_v4, %v1806_v4 }
 0x943   :  { %v1808_v9 = vmul.f32 %v1804_v6, %v1804_v6  ;;  %v1805_v10 = vsub.f32 %v2213_v7, %v2325_v16 }
 0x944   :  { %v1811_v18 = vmul.f32 %v1807_v14, %v1807_v14  ;;  %v1815_v11 = vsel %vm86_vm0, %v1810_v32, 0.0 }
 0x945   :  { %v1809_v29 = vmul.f32 %v1805_v10, %v1805_v10  ;;  %v1812_v54 = vsel %vm86_vm0, %v1808_v9, 0.0 }
 0x946   :  { %v1817_v22 = vsel %vm86_vm0, %v1811_v18, 0.0 }
 0x947   :  { %v1813_v19 = vsel %vm86_vm0, %v1809_v29, 0.0 }
 0x948   :  { %v1814_v20 = vadd.f32 %v1813_v19, %v1812_v54 }
 0x94a   :  { %v1816_v21 = vadd.f32 %v1815_v11, %v1814_v20 }
 0x94c   :  { %v1818_v23 = vadd.f32 %v1817_v22, %v1816_v21 }
 0x94e   :  { %1819 = vadd.xlane.f32.xlu0 %v1818_v23 }
 0x9db   :  { %v1820_v24 = vpop.xlane.xlu0 %1819 }
 0x9dc   :  { %v1821_v31 = vrot.slane %v1820_v24, 4 }
 0x9de   :  { %v1822_v25 = vadd.f32 %v1821_v31, %v1820_v24 }
 0x9e0   :  { %v1823_v36 = vrot.slane %v1822_v25, 2 }
 0x9e2   :  { %v1824_v37 = vadd.f32 %v1823_v36, %v1822_v25 }
 0x9e4   :  { %v1825_v39 = vrot.slane %v1824_v37, 1 }
 0x9e6   :  { %v1826_v43 = vadd.f32 %v1825_v39, %v1824_v37 }
 0x9e8   :  { %2242 = vpush %v1826_v43 }
 0x9e9   :  { %2244 = vpush %v1867_v44 }
 0xa19   :  { %s2243_s2 = spop %2242 }
 0xa1a   :  { %s2245_s5 = spop %2244  ;;  %v1828_v51 = vstv %s2243_s2 }
 0xa1b   :  { %v1869_v35 = vstv %s2245_s5 }
 0xa1c   :  { %v1870_v8 = vmul.f32 -0.5, %v1869_v35 }
 0xa1e   :  { %v1871_v46 = vadd.f32 %v1870_v8, %v1828_v51 }
 0xa20   :  { %v1872_v40 = vmul.f32 0.2, %v1871_v46  ;;  %v1873_v52 = vmul.f32 0.8, %v1871_v46 }
 0xa22   :  { %v1874_v53 = vadd.f32 %v1873_v52, %v1872_v40 }
 0xa24   :  { %v1876_v57 = vadd.f32 %v1875_v56, %v1874_v53 }
 0xa26   :  { %1878 = vst.msk [vmem:[#allocation2] sm:$0x1] %vm1877_vm4, %v1876_v57 }
 0xa27   :  { %2337 = shalt.err (!%p2334_p4)
}
 0xa28   :  { %s2338_s10 = scalar_lea.hbm %s2886_s16, 16 }
 0xa29   :  { %p2339_p5 = scmp.ne.s32.totalorder %s2886_s16, %s2338_s10  ;;  %p2342_p6 = scmp.lt.u32.totalorder %s2338_s10, %s2886_s16 }
 0xa2b   :  { %p2344_p7 = pnand %p2342_p6, %p2339_p5 }
 0xa2d   :  { %2347 = shalt.err (!%p2344_p7)
}
 0xa2e   :  { %1888 = dma.vmem_to_hbm [thread:$0]  %s1886_s28, 16, %s2886_s16, [#allocation3]  }
 0xa2f   :  { %2348 = dma.done.wait [#allocation3], 16  }
 0xa30   :  { %2349 = vsyncadd [#allocation3], 4294967280 }
 0xa31   :  { %1892 = vsyncpa [#allocation3], 1 }

</bundles_post_ra>
